<compile_context>
chip_gen: v6e
topology: v6e:2x2x1
jax: 0.10.0
libtpu: 0.0.40
codegen_flags: <defaults>
</compile_context>

<pallas_src>
import functools

import jax
import jax.numpy as jnp
from jax import lax
from jax.experimental import pallas as pl
from jax.experimental.pallas import tpu as pltpu
import numpy as np


# ----------------------------- fused Pallas kernel -----------------------------

def fused_lstm_fc_kernel(x_ref, wih0_ref, whh0_ref, b0_ref,
                         wih1_ref, whh1_ref, b1_ref,
                         wfc_ref, bfc_ref, o_ref, hseq_scr, *, T, B):
    """2-layer LSTM + fc head, fully resident in VMEM.

    x_ref    : (T*B, D)   time-major input, flattened over (t, b)
    wih*_ref : (D_in, 4H) pre-transposed input->gate weights (gate order i,f,g,o)
    whh*_ref : (H, 4H)    pre-transposed hidden->gate weights
    b*_ref   : (1, 4H)    combined b_ih + b_hh
    wfc_ref  : (H, 1), bfc_ref : (1, 1)
    o_ref    : (B, 1)
    hseq_scr : (T*B, H)   layer-0 hidden sequence (VMEM scratch, never hits HBM)
    """
    H = whh0_ref.shape[0]

    def run_layer(gx, whh, collect):
        # gx: (T*B, 4H) precomputed input projection (+bias).  Only the
        # h_prev @ W_hh matmul is serially dependent.
        h = jnp.zeros((B, H), jnp.float32)
        c = jnp.zeros((B, H), jnp.float32)
        # Static Python loop (T is tiny): fully unrolled, all indices static.
        for t in range(T):
            gates = gx[t * B:(t + 1) * B, :] + jnp.dot(
                h, whh, preferred_element_type=jnp.float32)      # (B, 4H)
            i_g = jax.nn.sigmoid(gates[:, 0 * H:1 * H])
            f_g = jax.nn.sigmoid(gates[:, 1 * H:2 * H])
            g_g = jnp.tanh(gates[:, 2 * H:3 * H])
            o_g = jax.nn.sigmoid(gates[:, 3 * H:4 * H])
            c = f_g * c + i_g * g_g
            h = o_g * jnp.tanh(c)
            if collect:
                hseq_scr[t * B:(t + 1) * B, :] = h
        return h

    # ---- layer 0: one batched [T*B, D] @ [D, 4H] projection, bias added once.
    gx0 = jnp.dot(x_ref[...], wih0_ref[...],
                  preferred_element_type=jnp.float32) + b0_ref[...]
    run_layer(gx0, whh0_ref[...], collect=True)

    # ---- layer 1: batched projection straight from the VMEM-resident hseq.
    gx1 = jnp.dot(hseq_scr[...], wih1_ref[...],
                  preferred_element_type=jnp.float32) + b1_ref[...]
    h_last = run_layer(gx1, whh1_ref[...], collect=False)

    # ---- fc head fused into the same kernel (out[:, -1, :] @ W_fc + b_fc).
    o_ref[...] = (jnp.dot(h_last, wfc_ref[...],
                          preferred_element_type=jnp.float32) + bfc_ref[...])


# ----------------------------- wrapper -----------------------------

def lstm_model_forward(x, params, d_feat):
    """x: [N, d_feat * T] -> [N] (same semantics as the PyTorch module)."""
    N = x.shape[0]
    x3 = x.reshape(N, d_feat, -1)                 # [N, D, T]
    T = x3.shape[-1]
    x_tbd = jnp.transpose(x3, (2, 0, 1))          # [T, N, D]  time-major
    x2d = x_tbd.reshape(T * N, d_feat).astype(jnp.float32)   # [T*B, D]

    l0, l1 = params["layers"]                     # module spec: num_layers=2
    H = l0["w_hh_t"].shape[0]
    D = d_feat

    kernel = functools.partial(fused_lstm_fc_kernel, T=T, B=N)
    y = pl.pallas_call(
        kernel,
        out_shape=jax.ShapeDtypeStruct((N, 1), jnp.float32),
        grid_spec=pltpu.PrefetchScalarGridSpec(
            num_scalar_prefetch=0,
            grid=(1,),
            in_specs=[
                pl.BlockSpec((T * N, D), lambda i: (0, 0)),
                pl.BlockSpec((D, 4 * H), lambda i: (0, 0)),
                pl.BlockSpec((H, 4 * H), lambda i: (0, 0)),
                pl.BlockSpec((1, 4 * H), lambda i: (0, 0)),
                pl.BlockSpec((H, 4 * H), lambda i: (0, 0)),
                pl.BlockSpec((H, 4 * H), lambda i: (0, 0)),
                pl.BlockSpec((1, 4 * H), lambda i: (0, 0)),
                pl.BlockSpec((H, 1), lambda i: (0, 0)),
                pl.BlockSpec((1, 1), lambda i: (0, 0)),
            ],
            out_specs=pl.BlockSpec((N, 1), lambda i: (0, 0)),
            scratch_shapes=[pltpu.VMEM((T * N, H), jnp.float32)],
        ),
        compiler_params=pltpu.CompilerParams(
            dimension_semantics=("arbitrary",)),
    )(x2d, l0["w_ih_t"], l0["w_hh_t"], l0["bias"],
      l1["w_ih_t"], l1["w_hh_t"], l1["bias"],
      params["w_fc_t"], params["b_fc"])
    return jnp.squeeze(y)                         # [N]


def init_params(key, d_feat, hidden_size, num_layers):
    """Deterministic params matching nn.LSTM / nn.Linear shapes (pre-transposed)."""
    params = {"layers": []}
    scale = 1.0 / np.sqrt(hidden_size)
    for layer in range(num_layers):
        in_dim = d_feat if layer == 0 else hidden_size
        key, k1, k2, k3, k4 = jax.random.split(key, 5)
        w_ih = jax.random.uniform(k1, (4 * hidden_size, in_dim),
                                  jnp.float32, -scale, scale)
        w_hh = jax.random.uniform(k2, (4 * hidden_size, hidden_size),
                                  jnp.float32, -scale, scale)
        b_ih = jax.random.uniform(k3, (4 * hidden_size,),
                                  jnp.float32, -scale, scale)
        b_hh = jax.random.uniform(k4, (4 * hidden_size,),
                                  jnp.float32, -scale, scale)
        params["layers"].append({
            "w_ih_t": jnp.transpose(w_ih),                     # [in, 4H]
            "w_hh_t": jnp.transpose(w_hh),                     # [H, 4H]
            "bias": (b_ih + b_hh).reshape(1, 4 * hidden_size)  # [1, 4H]
        })
    key, k5, k6 = jax.random.split(key, 3)
    fs = 1.0 / np.sqrt(hidden_size)
    w_fc = jax.random.uniform(k5, (1, hidden_size), jnp.float32, -fs, fs)
    b_fc = jax.random.uniform(k6, (1,), jnp.float32, -fs, fs)
    params["w_fc_t"] = jnp.transpose(w_fc)        # [H, 1]
    params["b_fc"] = b_fc.reshape(1, 1)
    return params


# ----------------------------- pure-JAX reference -----------------------------

def lstm_model_reference(x, params, d_feat):
    N = x.shape[0]
    xr = x.reshape(N, d_feat, -1)
    xr = jnp.transpose(xr, (0, 2, 1))             # [N, T, D]
    seq = jnp.transpose(xr, (1, 0, 2))            # [T, N, D]
    for lp in params["layers"]:
        H = lp["w_hh_t"].shape[0]
        B = seq.shape[1]

        def step(carry, x_t, lp=lp, H=H):
            h_prev, c_prev = carry
            gates = x_t @ lp["w_ih_t"] + h_prev @ lp["w_hh_t"] + lp["bias"]
            i = jax.nn.sigmoid(gates[:, 0 * H:1 * H])
            f = jax.nn.sigmoid(gates[:, 1 * H:2 * H])
            g = jnp.tanh(gates[:, 2 * H:3 * H])
            o = jax.nn.sigmoid(gates[:, 3 * H:4 * H])
            c = f * c_prev + i * g
            h = o * jnp.tanh(c)
            return (h, c), h

        init = (jnp.zeros((B, H), jnp.float32), jnp.zeros((B, H), jnp.float32))
        _, seq = lax.scan(step, init, seq)
    y = seq[-1] @ params["w_fc_t"] + params["b_fc"]
    return jnp.squeeze(y)


# ----------------------------- main -----------------------------

if __name__ == "__main__":
    d_feat, hidden_size, num_layers = 6, 32, 2
    batch, seq_len = 2, 8

    key = jax.random.PRNGKey(0)
    key, kx, kp = jax.random.split(key, 3)
    x = jax.random.normal(kx, (batch, d_feat * seq_len), jnp.float32)
    params = init_params(kp, d_feat, hidden_size, num_layers)

    out = lstm_model_forward(x, params, d_feat)
    out = jax.block_until_ready(out)

    ref = jax.block_until_ready(lstm_model_reference(x, params, d_feat))
    assert out.shape == (batch,), out.shape
    assert np.allclose(np.asarray(out), np.asarray(ref), rtol=1e-4, atol=1e-4)

    print("KERNEL_OK")
</pallas_src>

<mosaic_0001>
module attributes {stable_mosaic.version = 11 : i64} {
  func.func @fused_lstm_fc_kernel(%arg0: i32, %arg1: memref<16x6xf32, #tpu.memory_space<vmem>>, %arg2: memref<6x128xf32, #tpu.memory_space<vmem>>, %arg3: memref<32x128xf32, #tpu.memory_space<vmem>>, %arg4: memref<1x128xf32, #tpu.memory_space<vmem>>, %arg5: memref<32x128xf32, #tpu.memory_space<vmem>>, %arg6: memref<32x128xf32, #tpu.memory_space<vmem>>, %arg7: memref<1x128xf32, #tpu.memory_space<vmem>>, %arg8: memref<32x1xf32, #tpu.memory_space<vmem>>, %arg9: memref<1x1xf32, #tpu.memory_space<vmem>>, %arg10: memref<2x1xf32, #tpu.memory_space<vmem>>, %arg11: memref<16x32xf32, #tpu.memory_space<vmem>>) attributes {dimension_semantics = [#tpu.dimension_semantics<arbitrary>], iteration_bounds = array<i64: 1>, scalar_prefetch = 0 : i64, scratch_operands = 1 : i64, tpu.core_type = #tpu.core_type<tc>, window_params = [{pipeline_mode = #tpu.pipeline_mode<synchronous>, transform_indices = @transform_0, window_bounds = array<i64: 16, 6>}, {pipeline_mode = #tpu.pipeline_mode<synchronous>, transform_indices = @transform_1, window_bounds = array<i64: 6, 128>}, {pipeline_mode = #tpu.pipeline_mode<synchronous>, transform_indices = @transform_2, window_bounds = array<i64: 32, 128>}, {pipeline_mode = #tpu.pipeline_mode<synchronous>, transform_indices = @transform_3, window_bounds = array<i64: 1, 128>}, {pipeline_mode = #tpu.pipeline_mode<synchronous>, transform_indices = @transform_4, window_bounds = array<i64: 32, 128>}, {pipeline_mode = #tpu.pipeline_mode<synchronous>, transform_indices = @transform_5, window_bounds = array<i64: 32, 128>}, {pipeline_mode = #tpu.pipeline_mode<synchronous>, transform_indices = @transform_6, window_bounds = array<i64: 1, 128>}, {pipeline_mode = #tpu.pipeline_mode<synchronous>, transform_indices = @transform_7, window_bounds = array<i64: 32, 1>}, {pipeline_mode = #tpu.pipeline_mode<synchronous>, transform_indices = @transform_8, window_bounds = array<i64: 1, 1>}, {pipeline_mode = #tpu.pipeline_mode<synchronous>, transform_indices = @transform_9, window_bounds = array<i64: 2, 1>}]} {
    %c0 = arith.constant 0 : index
    %c0_0 = arith.constant 0 : index
    %0 = vector.load %arg1[%c0, %c0_0] : memref<16x6xf32, #tpu.memory_space<vmem>>, vector<16x6xf32>
    %c0_1 = arith.constant 0 : index
    %c0_2 = arith.constant 0 : index
    %1 = vector.load %arg2[%c0_1, %c0_2] : memref<6x128xf32, #tpu.memory_space<vmem>>, vector<6x128xf32>
    %cst = arith.constant dense<0.000000e+00> : vector<16x128xf32>
    %2 = tpu.matmul %0, %1, %cst {dimension_numbers = #tpu.dot_dimension_numbers<[1], [0], [0], [1], [0, 0, 1, 1], [], []>} : vector<16x6xf32>, vector<6x128xf32>, vector<16x128xf32> -> vector<16x128xf32>
    %c0_3 = arith.constant 0 : index
    %c0_4 = arith.constant 0 : index
    %3 = vector.load %arg4[%c0_3, %c0_4] : memref<1x128xf32, #tpu.memory_space<vmem>>, vector<1x128xf32>
    %4 = vector.broadcast %3 : vector<1x128xf32> to vector<16x128xf32>
    %5 = arith.addf %2, %4 : vector<16x128xf32>
    %c0_5 = arith.constant 0 : index
    %c0_6 = arith.constant 0 : index
    %6 = vector.load %arg3[%c0_5, %c0_6] : memref<32x128xf32, #tpu.memory_space<vmem>>, vector<32x128xf32>
    %cst_7 = arith.constant 0.000000e+00 : f32
    %7 = vector.broadcast %cst_7 : f32 to vector<2x32xf32>
    %cst_8 = arith.constant 0.000000e+00 : f32
    %8 = vector.broadcast %cst_8 : f32 to vector<2x32xf32>
    %9 = vector.extract_strided_slice %5 {offsets = [0, 0], sizes = [2, 128], strides = [1, 1]} : vector<16x128xf32> to vector<2x128xf32>
    %cst_9 = arith.constant dense<0.000000e+00> : vector<2x128xf32>
    %10 = tpu.matmul %7, %6, %cst_9 {dimension_numbers = #tpu.dot_dimension_numbers<[1], [0], [0], [1], [0, 0, 1, 1], [], []>} : vector<2x32xf32>, vector<32x128xf32>, vector<2x128xf32> -> vector<2x128xf32>
    %11 = arith.addf %9, %10 : vector<2x128xf32>
    %12 = vector.extract_strided_slice %11 {offsets = [0, 0], sizes = [2, 32], strides = [1, 1]} : vector<2x128xf32> to vector<2x32xf32>
    %13 = arith.negf %12 : vector<2x32xf32>
    %14 = math.exp %13 : vector<2x32xf32>
    %cst_10 = arith.constant 1.000000e+00 : f32
    %15 = vector.broadcast %cst_10 : f32 to vector<2x32xf32>
    %16 = arith.addf %15, %14 : vector<2x32xf32>
    %17 = arith.divf %15, %16 : vector<2x32xf32>
    %18 = vector.extract_strided_slice %11 {offsets = [0, 32], sizes = [2, 32], strides = [1, 1]} : vector<2x128xf32> to vector<2x32xf32>
    %19 = arith.negf %18 : vector<2x32xf32>
    %20 = math.exp %19 : vector<2x32xf32>
    %cst_11 = arith.constant 1.000000e+00 : f32
    %21 = vector.broadcast %cst_11 : f32 to vector<2x32xf32>
    %22 = arith.addf %21, %20 : vector<2x32xf32>
    %23 = arith.divf %21, %22 : vector<2x32xf32>
    %24 = vector.extract_strided_slice %11 {offsets = [0, 64], sizes = [2, 32], strides = [1, 1]} : vector<2x128xf32> to vector<2x32xf32>
    %25 = math.tanh %24 : vector<2x32xf32>
    %26 = vector.extract_strided_slice %11 {offsets = [0, 96], sizes = [2, 32], strides = [1, 1]} : vector<2x128xf32> to vector<2x32xf32>
    %27 = arith.negf %26 : vector<2x32xf32>
    %28 = math.exp %27 : vector<2x32xf32>
    %cst_12 = arith.constant 1.000000e+00 : f32
    %29 = vector.broadcast %cst_12 : f32 to vector<2x32xf32>
    %30 = arith.addf %29, %28 : vector<2x32xf32>
    %31 = arith.divf %29, %30 : vector<2x32xf32>
    %32 = arith.mulf %23, %8 : vector<2x32xf32>
    %33 = arith.mulf %17, %25 : vector<2x32xf32>
    %34 = arith.addf %32, %33 : vector<2x32xf32>
    %35 = math.tanh %34 : vector<2x32xf32>
    %36 = arith.mulf %31, %35 : vector<2x32xf32>
    %c0_13 = arith.constant 0 : index
    %c0_14 = arith.constant 0 : index
    %37 = vector.load %arg11[%c0_13, %c0_14] : memref<16x32xf32, #tpu.memory_space<vmem>>, vector<2x32xf32>
    tpu.vector_store %arg11[%c0_13, %c0_14], %36 {strides = array<i32>} : memref<16x32xf32, #tpu.memory_space<vmem>>, vector<2x32xf32>,
    %38 = vector.extract_strided_slice %5 {offsets = [2, 0], sizes = [2, 128], strides = [1, 1]} : vector<16x128xf32> to vector<2x128xf32>
    %cst_15 = arith.constant dense<0.000000e+00> : vector<2x128xf32>
    %39 = tpu.matmul %36, %6, %cst_15 {dimension_numbers = #tpu.dot_dimension_numbers<[1], [0], [0], [1], [0, 0, 1, 1], [], []>} : vector<2x32xf32>, vector<32x128xf32>, vector<2x128xf32> -> vector<2x128xf32>
    %40 = arith.addf %38, %39 : vector<2x128xf32>
    %41 = vector.extract_strided_slice %40 {offsets = [0, 0], sizes = [2, 32], strides = [1, 1]} : vector<2x128xf32> to vector<2x32xf32>
    %42 = arith.negf %41 : vector<2x32xf32>
    %43 = math.exp %42 : vector<2x32xf32>
    %cst_16 = arith.constant 1.000000e+00 : f32
    %44 = vector.broadcast %cst_16 : f32 to vector<2x32xf32>
    %45 = arith.addf %44, %43 : vector<2x32xf32>
    %46 = arith.divf %44, %45 : vector<2x32xf32>
    %47 = vector.extract_strided_slice %40 {offsets = [0, 32], sizes = [2, 32], strides = [1, 1]} : vector<2x128xf32> to vector<2x32xf32>
    %48 = arith.negf %47 : vector<2x32xf32>
    %49 = math.exp %48 : vector<2x32xf32>
    %cst_17 = arith.constant 1.000000e+00 : f32
    %50 = vector.broadcast %cst_17 : f32 to vector<2x32xf32>
    %51 = arith.addf %50, %49 : vector<2x32xf32>
    %52 = arith.divf %50, %51 : vector<2x32xf32>
    %53 = vector.extract_strided_slice %40 {offsets = [0, 64], sizes = [2, 32], strides = [1, 1]} : vector<2x128xf32> to vector<2x32xf32>
    %54 = math.tanh %53 : vector<2x32xf32>
    %55 = vector.extract_strided_slice %40 {offsets = [0, 96], sizes = [2, 32], strides = [1, 1]} : vector<2x128xf32> to vector<2x32xf32>
    %56 = arith.negf %55 : vector<2x32xf32>
    %57 = math.exp %56 : vector<2x32xf32>
    %cst_18 = arith.constant 1.000000e+00 : f32
    %58 = vector.broadcast %cst_18 : f32 to vector<2x32xf32>
    %59 = arith.addf %58, %57 : vector<2x32xf32>
    %60 = arith.divf %58, %59 : vector<2x32xf32>
    %61 = arith.mulf %52, %34 : vector<2x32xf32>
    %62 = arith.mulf %46, %54 : vector<2x32xf32>
    %63 = arith.addf %61, %62 : vector<2x32xf32>
    %64 = math.tanh %63 : vector<2x32xf32>
    %65 = arith.mulf %60, %64 : vector<2x32xf32>
    %c2 = arith.constant 2 : index
    %c0_19 = arith.constant 0 : index
    %66 = vector.load %arg11[%c2, %c0_19] : memref<16x32xf32, #tpu.memory_space<vmem>>, vector<2x32xf32>
    tpu.vector_store %arg11[%c2, %c0_19], %65 {strides = array<i32>} : memref<16x32xf32, #tpu.memory_space<vmem>>, vector<2x32xf32>,
    %67 = vector.extract_strided_slice %5 {offsets = [4, 0], sizes = [2, 128], strides = [1, 1]} : vector<16x128xf32> to vector<2x128xf32>
    %cst_20 = arith.constant dense<0.000000e+00> : vector<2x128xf32>
    %68 = tpu.matmul %65, %6, %cst_20 {dimension_numbers = #tpu.dot_dimension_numbers<[1], [0], [0], [1], [0, 0, 1, 1], [], []>} : vector<2x32xf32>, vector<32x128xf32>, vector<2x128xf32> -> vector<2x128xf32>
    %69 = arith.addf %67, %68 : vector<2x128xf32>
    %70 = vector.extract_strided_slice %69 {offsets = [0, 0], sizes = [2, 32], strides = [1, 1]} : vector<2x128xf32> to vector<2x32xf32>
    %71 = arith.negf %70 : vector<2x32xf32>
    %72 = math.exp %71 : vector<2x32xf32>
    %cst_21 = arith.constant 1.000000e+00 : f32
    %73 = vector.broadcast %cst_21 : f32 to vector<2x32xf32>
    %74 = arith.addf %73, %72 : vector<2x32xf32>
    %75 = arith.divf %73, %74 : vector<2x32xf32>
    %76 = vector.extract_strided_slice %69 {offsets = [0, 32], sizes = [2, 32], strides = [1, 1]} : vector<2x128xf32> to vector<2x32xf32>
    %77 = arith.negf %76 : vector<2x32xf32>
    %78 = math.exp %77 : vector<2x32xf32>
    %cst_22 = arith.constant 1.000000e+00 : f32
    %79 = vector.broadcast %cst_22 : f32 to vector<2x32xf32>
    %80 = arith.addf %79, %78 : vector<2x32xf32>
    %81 = arith.divf %79, %80 : vector<2x32xf32>
    %82 = vector.extract_strided_slice %69 {offsets = [0, 64], sizes = [2, 32], strides = [1, 1]} : vector<2x128xf32> to vector<2x32xf32>
    %83 = math.tanh %82 : vector<2x32xf32>
    %84 = vector.extract_strided_slice %69 {offsets = [0, 96], sizes = [2, 32], strides = [1, 1]} : vector<2x128xf32> to vector<2x32xf32>
    %85 = arith.negf %84 : vector<2x32xf32>
    %86 = math.exp %85 : vector<2x32xf32>
    %cst_23 = arith.constant 1.000000e+00 : f32
    %87 = vector.broadcast %cst_23 : f32 to vector<2x32xf32>
    %88 = arith.addf %87, %86 : vector<2x32xf32>
    %89 = arith.divf %87, %88 : vector<2x32xf32>
    %90 = arith.mulf %81, %63 : vector<2x32xf32>
    %91 = arith.mulf %75, %83 : vector<2x32xf32>
    %92 = arith.addf %90, %91 : vector<2x32xf32>
    %93 = math.tanh %92 : vector<2x32xf32>
    %94 = arith.mulf %89, %93 : vector<2x32xf32>
    %c4 = arith.constant 4 : index
    %c0_24 = arith.constant 0 : index
    %95 = vector.load %arg11[%c4, %c0_24] : memref<16x32xf32, #tpu.memory_space<vmem>>, vector<2x32xf32>
    tpu.vector_store %arg11[%c4, %c0_24], %94 {strides = array<i32>} : memref<16x32xf32, #tpu.memory_space<vmem>>, vector<2x32xf32>,
    %96 = vector.extract_strided_slice %5 {offsets = [6, 0], sizes = [2, 128], strides = [1, 1]} : vector<16x128xf32> to vector<2x128xf32>
    %cst_25 = arith.constant dense<0.000000e+00> : vector<2x128xf32>
    %97 = tpu.matmul %94, %6, %cst_25 {dimension_numbers = #tpu.dot_dimension_numbers<[1], [0], [0], [1], [0, 0, 1, 1], [], []>} : vector<2x32xf32>, vector<32x128xf32>, vector<2x128xf32> -> vector<2x128xf32>
    %98 = arith.addf %96, %97 : vector<2x128xf32>
    %99 = vector.extract_strided_slice %98 {offsets = [0, 0], sizes = [2, 32], strides = [1, 1]} : vector<2x128xf32> to vector<2x32xf32>
    %100 = arith.negf %99 : vector<2x32xf32>
    %101 = math.exp %100 : vector<2x32xf32>
    %cst_26 = arith.constant 1.000000e+00 : f32
    %102 = vector.broadcast %cst_26 : f32 to vector<2x32xf32>
    %103 = arith.addf %102, %101 : vector<2x32xf32>
    %104 = arith.divf %102, %103 : vector<2x32xf32>
    %105 = vector.extract_strided_slice %98 {offsets = [0, 32], sizes = [2, 32], strides = [1, 1]} : vector<2x128xf32> to vector<2x32xf32>
    %106 = arith.negf %105 : vector<2x32xf32>
    %107 = math.exp %106 : vector<2x32xf32>
    %cst_27 = arith.constant 1.000000e+00 : f32
    %108 = vector.broadcast %cst_27 : f32 to vector<2x32xf32>
    %109 = arith.addf %108, %107 : vector<2x32xf32>
    %110 = arith.divf %108, %109 : vector<2x32xf32>
    %111 = vector.extract_strided_slice %98 {offsets = [0, 64], sizes = [2, 32], strides = [1, 1]} : vector<2x128xf32> to vector<2x32xf32>
    %112 = math.tanh %111 : vector<2x32xf32>
    %113 = vector.extract_strided_slice %98 {offsets = [0, 96], sizes = [2, 32], strides = [1, 1]} : vector<2x128xf32> to vector<2x32xf32>
    %114 = arith.negf %113 : vector<2x32xf32>
    %115 = math.exp %114 : vector<2x32xf32>
    %cst_28 = arith.constant 1.000000e+00 : f32
    %116 = vector.broadcast %cst_28 : f32 to vector<2x32xf32>
    %117 = arith.addf %116, %115 : vector<2x32xf32>
    %118 = arith.divf %116, %117 : vector<2x32xf32>
    %119 = arith.mulf %110, %92 : vector<2x32xf32>
    %120 = arith.mulf %104, %112 : vector<2x32xf32>
    %121 = arith.addf %119, %120 : vector<2x32xf32>
    %122 = math.tanh %121 : vector<2x32xf32>
    %123 = arith.mulf %118, %122 : vector<2x32xf32>
    %c6 = arith.constant 6 : index
    %c0_29 = arith.constant 0 : index
    %124 = vector.load %arg11[%c6, %c0_29] : memref<16x32xf32, #tpu.memory_space<vmem>>, vector<2x32xf32>
    tpu.vector_store %arg11[%c6, %c0_29], %123 {strides = array<i32>} : memref<16x32xf32, #tpu.memory_space<vmem>>, vector<2x32xf32>,
    %125 = vector.extract_strided_slice %5 {offsets = [8, 0], sizes = [2, 128], strides = [1, 1]} : vector<16x128xf32> to vector<2x128xf32>
    %cst_30 = arith.constant dense<0.000000e+00> : vector<2x128xf32>
    %126 = tpu.matmul %123, %6, %cst_30 {dimension_numbers = #tpu.dot_dimension_numbers<[1], [0], [0], [1], [0, 0, 1, 1], [], []>} : vector<2x32xf32>, vector<32x128xf32>, vector<2x128xf32> -> vector<2x128xf32>
    %127 = arith.addf %125, %126 : vector<2x128xf32>
    %128 = vector.extract_strided_slice %127 {offsets = [0, 0], sizes = [2, 32], strides = [1, 1]} : vector<2x128xf32> to vector<2x32xf32>
    %129 = arith.negf %128 : vector<2x32xf32>
    %130 = math.exp %129 : vector<2x32xf32>
    %cst_31 = arith.constant 1.000000e+00 : f32
    %131 = vector.broadcast %cst_31 : f32 to vector<2x32xf32>
    %132 = arith.addf %131, %130 : vector<2x32xf32>
    %133 = arith.divf %131, %132 : vector<2x32xf32>
    %134 = vector.extract_strided_slice %127 {offsets = [0, 32], sizes = [2, 32], strides = [1, 1]} : vector<2x128xf32> to vector<2x32xf32>
    %135 = arith.negf %134 : vector<2x32xf32>
    %136 = math.exp %135 : vector<2x32xf32>
    %cst_32 = arith.constant 1.000000e+00 : f32
    %137 = vector.broadcast %cst_32 : f32 to vector<2x32xf32>
    %138 = arith.addf %137, %136 : vector<2x32xf32>
    %139 = arith.divf %137, %138 : vector<2x32xf32>
    %140 = vector.extract_strided_slice %127 {offsets = [0, 64], sizes = [2, 32], strides = [1, 1]} : vector<2x128xf32> to vector<2x32xf32>
    %141 = math.tanh %140 : vector<2x32xf32>
    %142 = vector.extract_strided_slice %127 {offsets = [0, 96], sizes = [2, 32], strides = [1, 1]} : vector<2x128xf32> to vector<2x32xf32>
    %143 = arith.negf %142 : vector<2x32xf32>
    %144 = math.exp %143 : vector<2x32xf32>
    %cst_33 = arith.constant 1.000000e+00 : f32
    %145 = vector.broadcast %cst_33 : f32 to vector<2x32xf32>
    %146 = arith.addf %145, %144 : vector<2x32xf32>
    %147 = arith.divf %145, %146 : vector<2x32xf32>
    %148 = arith.mulf %139, %121 : vector<2x32xf32>
    %149 = arith.mulf %133, %141 : vector<2x32xf32>
    %150 = arith.addf %148, %149 : vector<2x32xf32>
    %151 = math.tanh %150 : vector<2x32xf32>
    %152 = arith.mulf %147, %151 : vector<2x32xf32>
    %c8 = arith.constant 8 : index
    %c0_34 = arith.constant 0 : index
    %153 = vector.load %arg11[%c8, %c0_34] : memref<16x32xf32, #tpu.memory_space<vmem>>, vector<2x32xf32>
    tpu.vector_store %arg11[%c8, %c0_34], %152 {strides = array<i32>} : memref<16x32xf32, #tpu.memory_space<vmem>>, vector<2x32xf32>,
    %154 = vector.extract_strided_slice %5 {offsets = [10, 0], sizes = [2, 128], strides = [1, 1]} : vector<16x128xf32> to vector<2x128xf32>
    %cst_35 = arith.constant dense<0.000000e+00> : vector<2x128xf32>
    %155 = tpu.matmul %152, %6, %cst_35 {dimension_numbers = #tpu.dot_dimension_numbers<[1], [0], [0], [1], [0, 0, 1, 1], [], []>} : vector<2x32xf32>, vector<32x128xf32>, vector<2x128xf32> -> vector<2x128xf32>
    %156 = arith.addf %154, %155 : vector<2x128xf32>
    %157 = vector.extract_strided_slice %156 {offsets = [0, 0], sizes = [2, 32], strides = [1, 1]} : vector<2x128xf32> to vector<2x32xf32>
    %158 = arith.negf %157 : vector<2x32xf32>
    %159 = math.exp %158 : vector<2x32xf32>
    %cst_36 = arith.constant 1.000000e+00 : f32
    %160 = vector.broadcast %cst_36 : f32 to vector<2x32xf32>
    %161 = arith.addf %160, %159 : vector<2x32xf32>
    %162 = arith.divf %160, %161 : vector<2x32xf32>
    %163 = vector.extract_strided_slice %156 {offsets = [0, 32], sizes = [2, 32], strides = [1, 1]} : vector<2x128xf32> to vector<2x32xf32>
    %164 = arith.negf %163 : vector<2x32xf32>
    %165 = math.exp %164 : vector<2x32xf32>
    %cst_37 = arith.constant 1.000000e+00 : f32
    %166 = vector.broadcast %cst_37 : f32 to vector<2x32xf32>
    %167 = arith.addf %166, %165 : vector<2x32xf32>
    %168 = arith.divf %166, %167 : vector<2x32xf32>
    %169 = vector.extract_strided_slice %156 {offsets = [0, 64], sizes = [2, 32], strides = [1, 1]} : vector<2x128xf32> to vector<2x32xf32>
    %170 = math.tanh %169 : vector<2x32xf32>
    %171 = vector.extract_strided_slice %156 {offsets = [0, 96], sizes = [2, 32], strides = [1, 1]} : vector<2x128xf32> to vector<2x32xf32>
    %172 = arith.negf %171 : vector<2x32xf32>
    %173 = math.exp %172 : vector<2x32xf32>
    %cst_38 = arith.constant 1.000000e+00 : f32
    %174 = vector.broadcast %cst_38 : f32 to vector<2x32xf32>
    %175 = arith.addf %174, %173 : vector<2x32xf32>
    %176 = arith.divf %174, %175 : vector<2x32xf32>
    %177 = arith.mulf %168, %150 : vector<2x32xf32>
    %178 = arith.mulf %162, %170 : vector<2x32xf32>
    %179 = arith.addf %177, %178 : vector<2x32xf32>
    %180 = math.tanh %179 : vector<2x32xf32>
    %181 = arith.mulf %176, %180 : vector<2x32xf32>
    %c10 = arith.constant 10 : index
    %c0_39 = arith.constant 0 : index
    %182 = vector.load %arg11[%c10, %c0_39] : memref<16x32xf32, #tpu.memory_space<vmem>>, vector<2x32xf32>
    tpu.vector_store %arg11[%c10, %c0_39], %181 {strides = array<i32>} : memref<16x32xf32, #tpu.memory_space<vmem>>, vector<2x32xf32>,
    %183 = vector.extract_strided_slice %5 {offsets = [12, 0], sizes = [2, 128], strides = [1, 1]} : vector<16x128xf32> to vector<2x128xf32>
    %cst_40 = arith.constant dense<0.000000e+00> : vector<2x128xf32>
    %184 = tpu.matmul %181, %6, %cst_40 {dimension_numbers = #tpu.dot_dimension_numbers<[1], [0], [0], [1], [0, 0, 1, 1], [], []>} : vector<2x32xf32>, vector<32x128xf32>, vector<2x128xf32> -> vector<2x128xf32>
    %185 = arith.addf %183, %184 : vector<2x128xf32>
    %186 = vector.extract_strided_slice %185 {offsets = [0, 0], sizes = [2, 32], strides = [1, 1]} : vector<2x128xf32> to vector<2x32xf32>
    %187 = arith.negf %186 : vector<2x32xf32>
    %188 = math.exp %187 : vector<2x32xf32>
    %cst_41 = arith.constant 1.000000e+00 : f32
    %189 = vector.broadcast %cst_41 : f32 to vector<2x32xf32>
    %190 = arith.addf %189, %188 : vector<2x32xf32>
    %191 = arith.divf %189, %190 : vector<2x32xf32>
    %192 = vector.extract_strided_slice %185 {offsets = [0, 32], sizes = [2, 32], strides = [1, 1]} : vector<2x128xf32> to vector<2x32xf32>
    %193 = arith.negf %192 : vector<2x32xf32>
    %194 = math.exp %193 : vector<2x32xf32>
    %cst_42 = arith.constant 1.000000e+00 : f32
    %195 = vector.broadcast %cst_42 : f32 to vector<2x32xf32>
    %196 = arith.addf %195, %194 : vector<2x32xf32>
    %197 = arith.divf %195, %196 : vector<2x32xf32>
    %198 = vector.extract_strided_slice %185 {offsets = [0, 64], sizes = [2, 32], strides = [1, 1]} : vector<2x128xf32> to vector<2x32xf32>
    %199 = math.tanh %198 : vector<2x32xf32>
    %200 = vector.extract_strided_slice %185 {offsets = [0, 96], sizes = [2, 32], strides = [1, 1]} : vector<2x128xf32> to vector<2x32xf32>
    %201 = arith.negf %200 : vector<2x32xf32>
    %202 = math.exp %201 : vector<2x32xf32>
    %cst_43 = arith.constant 1.000000e+00 : f32
    %203 = vector.broadcast %cst_43 : f32 to vector<2x32xf32>
    %204 = arith.addf %203, %202 : vector<2x32xf32>
    %205 = arith.divf %203, %204 : vector<2x32xf32>
    %206 = arith.mulf %197, %179 : vector<2x32xf32>
    %207 = arith.mulf %191, %199 : vector<2x32xf32>
    %208 = arith.addf %206, %207 : vector<2x32xf32>
    %209 = math.tanh %208 : vector<2x32xf32>
    %210 = arith.mulf %205, %209 : vector<2x32xf32>
    %c12 = arith.constant 12 : index
    %c0_44 = arith.constant 0 : index
    %211 = vector.load %arg11[%c12, %c0_44] : memref<16x32xf32, #tpu.memory_space<vmem>>, vector<2x32xf32>
    tpu.vector_store %arg11[%c12, %c0_44], %210 {strides = array<i32>} : memref<16x32xf32, #tpu.memory_space<vmem>>, vector<2x32xf32>,
    %212 = vector.extract_strided_slice %5 {offsets = [14, 0], sizes = [2, 128], strides = [1, 1]} : vector<16x128xf32> to vector<2x128xf32>
    %cst_45 = arith.constant dense<0.000000e+00> : vector<2x128xf32>
    %213 = tpu.matmul %210, %6, %cst_45 {dimension_numbers = #tpu.dot_dimension_numbers<[1], [0], [0], [1], [0, 0, 1, 1], [], []>} : vector<2x32xf32>, vector<32x128xf32>, vector<2x128xf32> -> vector<2x128xf32>
    %214 = arith.addf %212, %213 : vector<2x128xf32>
    %215 = vector.extract_strided_slice %214 {offsets = [0, 0], sizes = [2, 32], strides = [1, 1]} : vector<2x128xf32> to vector<2x32xf32>
    %216 = arith.negf %215 : vector<2x32xf32>
    %217 = math.exp %216 : vector<2x32xf32>
    %cst_46 = arith.constant 1.000000e+00 : f32
    %218 = vector.broadcast %cst_46 : f32 to vector<2x32xf32>
    %219 = arith.addf %218, %217 : vector<2x32xf32>
    %220 = arith.divf %218, %219 : vector<2x32xf32>
    %221 = vector.extract_strided_slice %214 {offsets = [0, 32], sizes = [2, 32], strides = [1, 1]} : vector<2x128xf32> to vector<2x32xf32>
    %222 = arith.negf %221 : vector<2x32xf32>
    %223 = math.exp %222 : vector<2x32xf32>
    %cst_47 = arith.constant 1.000000e+00 : f32
    %224 = vector.broadcast %cst_47 : f32 to vector<2x32xf32>
    %225 = arith.addf %224, %223 : vector<2x32xf32>
    %226 = arith.divf %224, %225 : vector<2x32xf32>
    %227 = vector.extract_strided_slice %214 {offsets = [0, 64], sizes = [2, 32], strides = [1, 1]} : vector<2x128xf32> to vector<2x32xf32>
    %228 = math.tanh %227 : vector<2x32xf32>
    %229 = vector.extract_strided_slice %214 {offsets = [0, 96], sizes = [2, 32], strides = [1, 1]} : vector<2x128xf32> to vector<2x32xf32>
    %230 = arith.negf %229 : vector<2x32xf32>
    %231 = math.exp %230 : vector<2x32xf32>
    %cst_48 = arith.constant 1.000000e+00 : f32
    %232 = vector.broadcast %cst_48 : f32 to vector<2x32xf32>
    %233 = arith.addf %232, %231 : vector<2x32xf32>
    %234 = arith.divf %232, %233 : vector<2x32xf32>
    %235 = arith.mulf %226, %208 : vector<2x32xf32>
    %236 = arith.mulf %220, %228 : vector<2x32xf32>
    %237 = arith.addf %235, %236 : vector<2x32xf32>
    %238 = math.tanh %237 : vector<2x32xf32>
    %239 = arith.mulf %234, %238 : vector<2x32xf32>
    %c14 = arith.constant 14 : index
    %c0_49 = arith.constant 0 : index
    %240 = vector.load %arg11[%c14, %c0_49] : memref<16x32xf32, #tpu.memory_space<vmem>>, vector<2x32xf32>
    tpu.vector_store %arg11[%c14, %c0_49], %239 {strides = array<i32>} : memref<16x32xf32, #tpu.memory_space<vmem>>, vector<2x32xf32>,
    %c0_50 = arith.constant 0 : index
    %c0_51 = arith.constant 0 : index
    %241 = vector.load %arg11[%c0_50, %c0_51] : memref<16x32xf32, #tpu.memory_space<vmem>>, vector<16x32xf32>
    %c0_52 = arith.constant 0 : index
    %c0_53 = arith.constant 0 : index
    %242 = vector.load %arg5[%c0_52, %c0_53] : memref<32x128xf32, #tpu.memory_space<vmem>>, vector<32x128xf32>
    %cst_54 = arith.constant dense<0.000000e+00> : vector<16x128xf32>
    %243 = tpu.matmul %241, %242, %cst_54 {dimension_numbers = #tpu.dot_dimension_numbers<[1], [0], [0], [1], [0, 0, 1, 1], [], []>} : vector<16x32xf32>, vector<32x128xf32>, vector<16x128xf32> -> vector<16x128xf32>
    %c0_55 = arith.constant 0 : index
    %c0_56 = arith.constant 0 : index
    %244 = vector.load %arg7[%c0_55, %c0_56] : memref<1x128xf32, #tpu.memory_space<vmem>>, vector<1x128xf32>
    %245 = vector.broadcast %244 : vector<1x128xf32> to vector<16x128xf32>
    %246 = arith.addf %243, %245 : vector<16x128xf32>
    %c0_57 = arith.constant 0 : index
    %c0_58 = arith.constant 0 : index
    %247 = vector.load %arg6[%c0_57, %c0_58] : memref<32x128xf32, #tpu.memory_space<vmem>>, vector<32x128xf32>
    %cst_59 = arith.constant 0.000000e+00 : f32
    %248 = vector.broadcast %cst_59 : f32 to vector<2x32xf32>
    %cst_60 = arith.constant 0.000000e+00 : f32
    %249 = vector.broadcast %cst_60 : f32 to vector<2x32xf32>
    %250 = vector.extract_strided_slice %246 {offsets = [0, 0], sizes = [2, 128], strides = [1, 1]} : vector<16x128xf32> to vector<2x128xf32>
    %cst_61 = arith.constant dense<0.000000e+00> : vector<2x128xf32>
    %251 = tpu.matmul %248, %247, %cst_61 {dimension_numbers = #tpu.dot_dimension_numbers<[1], [0], [0], [1], [0, 0, 1, 1], [], []>} : vector<2x32xf32>, vector<32x128xf32>, vector<2x128xf32> -> vector<2x128xf32>
    %252 = arith.addf %250, %251 : vector<2x128xf32>
    %253 = vector.extract_strided_slice %252 {offsets = [0, 0], sizes = [2, 32], strides = [1, 1]} : vector<2x128xf32> to vector<2x32xf32>
    %254 = arith.negf %253 : vector<2x32xf32>
    %255 = math.exp %254 : vector<2x32xf32>
    %cst_62 = arith.constant 1.000000e+00 : f32
    %256 = vector.broadcast %cst_62 : f32 to vector<2x32xf32>
    %257 = arith.addf %256, %255 : vector<2x32xf32>
    %258 = arith.divf %256, %257 : vector<2x32xf32>
    %259 = vector.extract_strided_slice %252 {offsets = [0, 32], sizes = [2, 32], strides = [1, 1]} : vector<2x128xf32> to vector<2x32xf32>
    %260 = arith.negf %259 : vector<2x32xf32>
    %261 = math.exp %260 : vector<2x32xf32>
    %cst_63 = arith.constant 1.000000e+00 : f32
    %262 = vector.broadcast %cst_63 : f32 to vector<2x32xf32>
    %263 = arith.addf %262, %261 : vector<2x32xf32>
    %264 = arith.divf %262, %263 : vector<2x32xf32>
    %265 = vector.extract_strided_slice %252 {offsets = [0, 64], sizes = [2, 32], strides = [1, 1]} : vector<2x128xf32> to vector<2x32xf32>
    %266 = math.tanh %265 : vector<2x32xf32>
    %267 = vector.extract_strided_slice %252 {offsets = [0, 96], sizes = [2, 32], strides = [1, 1]} : vector<2x128xf32> to vector<2x32xf32>
    %268 = arith.negf %267 : vector<2x32xf32>
    %269 = math.exp %268 : vector<2x32xf32>
    %cst_64 = arith.constant 1.000000e+00 : f32
    %270 = vector.broadcast %cst_64 : f32 to vector<2x32xf32>
    %271 = arith.addf %270, %269 : vector<2x32xf32>
    %272 = arith.divf %270, %271 : vector<2x32xf32>
    %273 = arith.mulf %264, %249 : vector<2x32xf32>
    %274 = arith.mulf %258, %266 : vector<2x32xf32>
    %275 = arith.addf %273, %274 : vector<2x32xf32>
    %276 = math.tanh %275 : vector<2x32xf32>
    %277 = arith.mulf %272, %276 : vector<2x32xf32>
    %278 = vector.extract_strided_slice %246 {offsets = [2, 0], sizes = [2, 128], strides = [1, 1]} : vector<16x128xf32> to vector<2x128xf32>
    %cst_65 = arith.constant dense<0.000000e+00> : vector<2x128xf32>
    %279 = tpu.matmul %277, %247, %cst_65 {dimension_numbers = #tpu.dot_dimension_numbers<[1], [0], [0], [1], [0, 0, 1, 1], [], []>} : vector<2x32xf32>, vector<32x128xf32>, vector<2x128xf32> -> vector<2x128xf32>
    %280 = arith.addf %278, %279 : vector<2x128xf32>
    %281 = vector.extract_strided_slice %280 {offsets = [0, 0], sizes = [2, 32], strides = [1, 1]} : vector<2x128xf32> to vector<2x32xf32>
    %282 = arith.negf %281 : vector<2x32xf32>
    %283 = math.exp %282 : vector<2x32xf32>
    %cst_66 = arith.constant 1.000000e+00 : f32
    %284 = vector.broadcast %cst_66 : f32 to vector<2x32xf32>
    %285 = arith.addf %284, %283 : vector<2x32xf32>
    %286 = arith.divf %284, %285 : vector<2x32xf32>
    %287 = vector.extract_strided_slice %280 {offsets = [0, 32], sizes = [2, 32], strides = [1, 1]} : vector<2x128xf32> to vector<2x32xf32>
    %288 = arith.negf %287 : vector<2x32xf32>
    %289 = math.exp %288 : vector<2x32xf32>
    %cst_67 = arith.constant 1.000000e+00 : f32
    %290 = vector.broadcast %cst_67 : f32 to vector<2x32xf32>
    %291 = arith.addf %290, %289 : vector<2x32xf32>
    %292 = arith.divf %290, %291 : vector<2x32xf32>
    %293 = vector.extract_strided_slice %280 {offsets = [0, 64], sizes = [2, 32], strides = [1, 1]} : vector<2x128xf32> to vector<2x32xf32>
    %294 = math.tanh %293 : vector<2x32xf32>
    %295 = vector.extract_strided_slice %280 {offsets = [0, 96], sizes = [2, 32], strides = [1, 1]} : vector<2x128xf32> to vector<2x32xf32>
    %296 = arith.negf %295 : vector<2x32xf32>
    %297 = math.exp %296 : vector<2x32xf32>
    %cst_68 = arith.constant 1.000000e+00 : f32
    %298 = vector.broadcast %cst_68 : f32 to vector<2x32xf32>
    %299 = arith.addf %298, %297 : vector<2x32xf32>
    %300 = arith.divf %298, %299 : vector<2x32xf32>
    %301 = arith.mulf %292, %275 : vector<2x32xf32>
    %302 = arith.mulf %286, %294 : vector<2x32xf32>
    %303 = arith.addf %301, %302 : vector<2x32xf32>
    %304 = math.tanh %303 : vector<2x32xf32>
    %305 = arith.mulf %300, %304 : vector<2x32xf32>
    %306 = vector.extract_strided_slice %246 {offsets = [4, 0], sizes = [2, 128], strides = [1, 1]} : vector<16x128xf32> to vector<2x128xf32>
    %cst_69 = arith.constant dense<0.000000e+00> : vector<2x128xf32>
    %307 = tpu.matmul %305, %247, %cst_69 {dimension_numbers = #tpu.dot_dimension_numbers<[1], [0], [0], [1], [0, 0, 1, 1], [], []>} : vector<2x32xf32>, vector<32x128xf32>, vector<2x128xf32> -> vector<2x128xf32>
    %308 = arith.addf %306, %307 : vector<2x128xf32>
    %309 = vector.extract_strided_slice %308 {offsets = [0, 0], sizes = [2, 32], strides = [1, 1]} : vector<2x128xf32> to vector<2x32xf32>
    %310 = arith.negf %309 : vector<2x32xf32>
    %311 = math.exp %310 : vector<2x32xf32>
    %cst_70 = arith.constant 1.000000e+00 : f32
    %312 = vector.broadcast %cst_70 : f32 to vector<2x32xf32>
    %313 = arith.addf %312, %311 : vector<2x32xf32>
    %314 = arith.divf %312, %313 : vector<2x32xf32>
    %315 = vector.extract_strided_slice %308 {offsets = [0, 32], sizes = [2, 32], strides = [1, 1]} : vector<2x128xf32> to vector<2x32xf32>
    %316 = arith.negf %315 : vector<2x32xf32>
    %317 = math.exp %316 : vector<2x32xf32>
    %cst_71 = arith.constant 1.000000e+00 : f32
    %318 = vector.broadcast %cst_71 : f32 to vector<2x32xf32>
    %319 = arith.addf %318, %317 : vector<2x32xf32>
    %320 = arith.divf %318, %319 : vector<2x32xf32>
    %321 = vector.extract_strided_slice %308 {offsets = [0, 64], sizes = [2, 32], strides = [1, 1]} : vector<2x128xf32> to vector<2x32xf32>
    %322 = math.tanh %321 : vector<2x32xf32>
    %323 = vector.extract_strided_slice %308 {offsets = [0, 96], sizes = [2, 32], strides = [1, 1]} : vector<2x128xf32> to vector<2x32xf32>
    %324 = arith.negf %323 : vector<2x32xf32>
    %325 = math.exp %324 : vector<2x32xf32>
    %cst_72 = arith.constant 1.000000e+00 : f32
    %326 = vector.broadcast %cst_72 : f32 to vector<2x32xf32>
    %327 = arith.addf %326, %325 : vector<2x32xf32>
    %328 = arith.divf %326, %327 : vector<2x32xf32>
    %329 = arith.mulf %320, %303 : vector<2x32xf32>
    %330 = arith.mulf %314, %322 : vector<2x32xf32>
    %331 = arith.addf %329, %330 : vector<2x32xf32>
    %332 = math.tanh %331 : vector<2x32xf32>
    %333 = arith.mulf %328, %332 : vector<2x32xf32>
    %334 = vector.extract_strided_slice %246 {offsets = [6, 0], sizes = [2, 128], strides = [1, 1]} : vector<16x128xf32> to vector<2x128xf32>
    %cst_73 = arith.constant dense<0.000000e+00> : vector<2x128xf32>
    %335 = tpu.matmul %333, %247, %cst_73 {dimension_numbers = #tpu.dot_dimension_numbers<[1], [0], [0], [1], [0, 0, 1, 1], [], []>} : vector<2x32xf32>, vector<32x128xf32>, vector<2x128xf32> -> vector<2x128xf32>
    %336 = arith.addf %334, %335 : vector<2x128xf32>
    %337 = vector.extract_strided_slice %336 {offsets = [0, 0], sizes = [2, 32], strides = [1, 1]} : vector<2x128xf32> to vector<2x32xf32>
    %338 = arith.negf %337 : vector<2x32xf32>
    %339 = math.exp %338 : vector<2x32xf32>
    %cst_74 = arith.constant 1.000000e+00 : f32
    %340 = vector.broadcast %cst_74 : f32 to vector<2x32xf32>
    %341 = arith.addf %340, %339 : vector<2x32xf32>
    %342 = arith.divf %340, %341 : vector<2x32xf32>
    %343 = vector.extract_strided_slice %336 {offsets = [0, 32], sizes = [2, 32], strides = [1, 1]} : vector<2x128xf32> to vector<2x32xf32>
    %344 = arith.negf %343 : vector<2x32xf32>
    %345 = math.exp %344 : vector<2x32xf32>
    %cst_75 = arith.constant 1.000000e+00 : f32
    %346 = vector.broadcast %cst_75 : f32 to vector<2x32xf32>
    %347 = arith.addf %346, %345 : vector<2x32xf32>
    %348 = arith.divf %346, %347 : vector<2x32xf32>
    %349 = vector.extract_strided_slice %336 {offsets = [0, 64], sizes = [2, 32], strides = [1, 1]} : vector<2x128xf32> to vector<2x32xf32>
    %350 = math.tanh %349 : vector<2x32xf32>
    %351 = vector.extract_strided_slice %336 {offsets = [0, 96], sizes = [2, 32], strides = [1, 1]} : vector<2x128xf32> to vector<2x32xf32>
    %352 = arith.negf %351 : vector<2x32xf32>
    %353 = math.exp %352 : vector<2x32xf32>
    %cst_76 = arith.constant 1.000000e+00 : f32
    %354 = vector.broadcast %cst_76 : f32 to vector<2x32xf32>
    %355 = arith.addf %354, %353 : vector<2x32xf32>
    %356 = arith.divf %354, %355 : vector<2x32xf32>
    %357 = arith.mulf %348, %331 : vector<2x32xf32>
    %358 = arith.mulf %342, %350 : vector<2x32xf32>
    %359 = arith.addf %357, %358 : vector<2x32xf32>
    %360 = math.tanh %359 : vector<2x32xf32>
    %361 = arith.mulf %356, %360 : vector<2x32xf32>
    %362 = vector.extract_strided_slice %246 {offsets = [8, 0], sizes = [2, 128], strides = [1, 1]} : vector<16x128xf32> to vector<2x128xf32>
    %cst_77 = arith.constant dense<0.000000e+00> : vector<2x128xf32>
    %363 = tpu.matmul %361, %247, %cst_77 {dimension_numbers = #tpu.dot_dimension_numbers<[1], [0], [0], [1], [0, 0, 1, 1], [], []>} : vector<2x32xf32>, vector<32x128xf32>, vector<2x128xf32> -> vector<2x128xf32>
    %364 = arith.addf %362, %363 : vector<2x128xf32>
    %365 = vector.extract_strided_slice %364 {offsets = [0, 0], sizes = [2, 32], strides = [1, 1]} : vector<2x128xf32> to vector<2x32xf32>
    %366 = arith.negf %365 : vector<2x32xf32>
    %367 = math.exp %366 : vector<2x32xf32>
    %cst_78 = arith.constant 1.000000e+00 : f32
    %368 = vector.broadcast %cst_78 : f32 to vector<2x32xf32>
    %369 = arith.addf %368, %367 : vector<2x32xf32>
    %370 = arith.divf %368, %369 : vector<2x32xf32>
    %371 = vector.extract_strided_slice %364 {offsets = [0, 32], sizes = [2, 32], strides = [1, 1]} : vector<2x128xf32> to vector<2x32xf32>
    %372 = arith.negf %371 : vector<2x32xf32>
    %373 = math.exp %372 : vector<2x32xf32>
    %cst_79 = arith.constant 1.000000e+00 : f32
    %374 = vector.broadcast %cst_79 : f32 to vector<2x32xf32>
    %375 = arith.addf %374, %373 : vector<2x32xf32>
    %376 = arith.divf %374, %375 : vector<2x32xf32>
    %377 = vector.extract_strided_slice %364 {offsets = [0, 64], sizes = [2, 32], strides = [1, 1]} : vector<2x128xf32> to vector<2x32xf32>
    %378 = math.tanh %377 : vector<2x32xf32>
    %379 = vector.extract_strided_slice %364 {offsets = [0, 96], sizes = [2, 32], strides = [1, 1]} : vector<2x128xf32> to vector<2x32xf32>
    %380 = arith.negf %379 : vector<2x32xf32>
    %381 = math.exp %380 : vector<2x32xf32>
    %cst_80 = arith.constant 1.000000e+00 : f32
    %382 = vector.broadcast %cst_80 : f32 to vector<2x32xf32>
    %383 = arith.addf %382, %381 : vector<2x32xf32>
    %384 = arith.divf %382, %383 : vector<2x32xf32>
    %385 = arith.mulf %376, %359 : vector<2x32xf32>
    %386 = arith.mulf %370, %378 : vector<2x32xf32>
    %387 = arith.addf %385, %386 : vector<2x32xf32>
    %388 = math.tanh %387 : vector<2x32xf32>
    %389 = arith.mulf %384, %388 : vector<2x32xf32>
    %390 = vector.extract_strided_slice %246 {offsets = [10, 0], sizes = [2, 128], strides = [1, 1]} : vector<16x128xf32> to vector<2x128xf32>
    %cst_81 = arith.constant dense<0.000000e+00> : vector<2x128xf32>
    %391 = tpu.matmul %389, %247, %cst_81 {dimension_numbers = #tpu.dot_dimension_numbers<[1], [0], [0], [1], [0, 0, 1, 1], [], []>} : vector<2x32xf32>, vector<32x128xf32>, vector<2x128xf32> -> vector<2x128xf32>
    %392 = arith.addf %390, %391 : vector<2x128xf32>
    %393 = vector.extract_strided_slice %392 {offsets = [0, 0], sizes = [2, 32], strides = [1, 1]} : vector<2x128xf32> to vector<2x32xf32>
    %394 = arith.negf %393 : vector<2x32xf32>
    %395 = math.exp %394 : vector<2x32xf32>
    %cst_82 = arith.constant 1.000000e+00 : f32
    %396 = vector.broadcast %cst_82 : f32 to vector<2x32xf32>
    %397 = arith.addf %396, %395 : vector<2x32xf32>
    %398 = arith.divf %396, %397 : vector<2x32xf32>
    %399 = vector.extract_strided_slice %392 {offsets = [0, 32], sizes = [2, 32], strides = [1, 1]} : vector<2x128xf32> to vector<2x32xf32>
    %400 = arith.negf %399 : vector<2x32xf32>
    %401 = math.exp %400 : vector<2x32xf32>
    %cst_83 = arith.constant 1.000000e+00 : f32
    %402 = vector.broadcast %cst_83 : f32 to vector<2x32xf32>
    %403 = arith.addf %402, %401 : vector<2x32xf32>
    %404 = arith.divf %402, %403 : vector<2x32xf32>
    %405 = vector.extract_strided_slice %392 {offsets = [0, 64], sizes = [2, 32], strides = [1, 1]} : vector<2x128xf32> to vector<2x32xf32>
    %406 = math.tanh %405 : vector<2x32xf32>
    %407 = vector.extract_strided_slice %392 {offsets = [0, 96], sizes = [2, 32], strides = [1, 1]} : vector<2x128xf32> to vector<2x32xf32>
    %408 = arith.negf %407 : vector<2x32xf32>
    %409 = math.exp %408 : vector<2x32xf32>
    %cst_84 = arith.constant 1.000000e+00 : f32
    %410 = vector.broadcast %cst_84 : f32 to vector<2x32xf32>
    %411 = arith.addf %410, %409 : vector<2x32xf32>
    %412 = arith.divf %410, %411 : vector<2x32xf32>
    %413 = arith.mulf %404, %387 : vector<2x32xf32>
    %414 = arith.mulf %398, %406 : vector<2x32xf32>
    %415 = arith.addf %413, %414 : vector<2x32xf32>
    %416 = math.tanh %415 : vector<2x32xf32>
    %417 = arith.mulf %412, %416 : vector<2x32xf32>
    %418 = vector.extract_strided_slice %246 {offsets = [12, 0], sizes = [2, 128], strides = [1, 1]} : vector<16x128xf32> to vector<2x128xf32>
    %cst_85 = arith.constant dense<0.000000e+00> : vector<2x128xf32>
    %419 = tpu.matmul %417, %247, %cst_85 {dimension_numbers = #tpu.dot_dimension_numbers<[1], [0], [0], [1], [0, 0, 1, 1], [], []>} : vector<2x32xf32>, vector<32x128xf32>, vector<2x128xf32> -> vector<2x128xf32>
    %420 = arith.addf %418, %419 : vector<2x128xf32>
    %421 = vector.extract_strided_slice %420 {offsets = [0, 0], sizes = [2, 32], strides = [1, 1]} : vector<2x128xf32> to vector<2x32xf32>
    %422 = arith.negf %421 : vector<2x32xf32>
    %423 = math.exp %422 : vector<2x32xf32>
    %cst_86 = arith.constant 1.000000e+00 : f32
    %424 = vector.broadcast %cst_86 : f32 to vector<2x32xf32>
    %425 = arith.addf %424, %423 : vector<2x32xf32>
    %426 = arith.divf %424, %425 : vector<2x32xf32>
    %427 = vector.extract_strided_slice %420 {offsets = [0, 32], sizes = [2, 32], strides = [1, 1]} : vector<2x128xf32> to vector<2x32xf32>
    %428 = arith.negf %427 : vector<2x32xf32>
    %429 = math.exp %428 : vector<2x32xf32>
    %cst_87 = arith.constant 1.000000e+00 : f32
    %430 = vector.broadcast %cst_87 : f32 to vector<2x32xf32>
    %431 = arith.addf %430, %429 : vector<2x32xf32>
    %432 = arith.divf %430, %431 : vector<2x32xf32>
    %433 = vector.extract_strided_slice %420 {offsets = [0, 64], sizes = [2, 32], strides = [1, 1]} : vector<2x128xf32> to vector<2x32xf32>
    %434 = math.tanh %433 : vector<2x32xf32>
    %435 = vector.extract_strided_slice %420 {offsets = [0, 96], sizes = [2, 32], strides = [1, 1]} : vector<2x128xf32> to vector<2x32xf32>
    %436 = arith.negf %435 : vector<2x32xf32>
    %437 = math.exp %436 : vector<2x32xf32>
    %cst_88 = arith.constant 1.000000e+00 : f32
    %438 = vector.broadcast %cst_88 : f32 to vector<2x32xf32>
    %439 = arith.addf %438, %437 : vector<2x32xf32>
    %440 = arith.divf %438, %439 : vector<2x32xf32>
    %441 = arith.mulf %432, %415 : vector<2x32xf32>
    %442 = arith.mulf %426, %434 : vector<2x32xf32>
    %443 = arith.addf %441, %442 : vector<2x32xf32>
    %444 = math.tanh %443 : vector<2x32xf32>
    %445 = arith.mulf %440, %444 : vector<2x32xf32>
    %446 = vector.extract_strided_slice %246 {offsets = [14, 0], sizes = [2, 128], strides = [1, 1]} : vector<16x128xf32> to vector<2x128xf32>
    %cst_89 = arith.constant dense<0.000000e+00> : vector<2x128xf32>
    %447 = tpu.matmul %445, %247, %cst_89 {dimension_numbers = #tpu.dot_dimension_numbers<[1], [0], [0], [1], [0, 0, 1, 1], [], []>} : vector<2x32xf32>, vector<32x128xf32>, vector<2x128xf32> -> vector<2x128xf32>
    %448 = arith.addf %446, %447 : vector<2x128xf32>
    %449 = vector.extract_strided_slice %448 {offsets = [0, 0], sizes = [2, 32], strides = [1, 1]} : vector<2x128xf32> to vector<2x32xf32>
    %450 = arith.negf %449 : vector<2x32xf32>
    %451 = math.exp %450 : vector<2x32xf32>
    %cst_90 = arith.constant 1.000000e+00 : f32
    %452 = vector.broadcast %cst_90 : f32 to vector<2x32xf32>
    %453 = arith.addf %452, %451 : vector<2x32xf32>
    %454 = arith.divf %452, %453 : vector<2x32xf32>
    %455 = vector.extract_strided_slice %448 {offsets = [0, 32], sizes = [2, 32], strides = [1, 1]} : vector<2x128xf32> to vector<2x32xf32>
    %456 = arith.negf %455 : vector<2x32xf32>
    %457 = math.exp %456 : vector<2x32xf32>
    %cst_91 = arith.constant 1.000000e+00 : f32
    %458 = vector.broadcast %cst_91 : f32 to vector<2x32xf32>
    %459 = arith.addf %458, %457 : vector<2x32xf32>
    %460 = arith.divf %458, %459 : vector<2x32xf32>
    %461 = vector.extract_strided_slice %448 {offsets = [0, 64], sizes = [2, 32], strides = [1, 1]} : vector<2x128xf32> to vector<2x32xf32>
    %462 = math.tanh %461 : vector<2x32xf32>
    %463 = vector.extract_strided_slice %448 {offsets = [0, 96], sizes = [2, 32], strides = [1, 1]} : vector<2x128xf32> to vector<2x32xf32>
    %464 = arith.negf %463 : vector<2x32xf32>
    %465 = math.exp %464 : vector<2x32xf32>
    %cst_92 = arith.constant 1.000000e+00 : f32
    %466 = vector.broadcast %cst_92 : f32 to vector<2x32xf32>
    %467 = arith.addf %466, %465 : vector<2x32xf32>
    %468 = arith.divf %466, %467 : vector<2x32xf32>
    %469 = arith.mulf %460, %443 : vector<2x32xf32>
    %470 = arith.mulf %454, %462 : vector<2x32xf32>
    %471 = arith.addf %469, %470 : vector<2x32xf32>
    %472 = math.tanh %471 : vector<2x32xf32>
    %473 = arith.mulf %468, %472 : vector<2x32xf32>
    %c0_93 = arith.constant 0 : index
    %c0_94 = arith.constant 0 : index
    %474 = vector.load %arg8[%c0_93, %c0_94] : memref<32x1xf32, #tpu.memory_space<vmem>>, vector<32x1xf32>
    %cst_95 = arith.constant dense<0.000000e+00> : vector<2x1xf32>
    %475 = tpu.matmul %473, %474, %cst_95 {dimension_numbers = #tpu.dot_dimension_numbers<[1], [0], [0], [1], [0, 0, 1, 1], [], []>} : vector<2x32xf32>, vector<32x1xf32>, vector<2x1xf32> -> vector<2x1xf32>
    %c0_96 = arith.constant 0 : index
    %c0_97 = arith.constant 0 : index
    %476 = vector.load %arg9[%c0_96, %c0_97] : memref<1x1xf32, #tpu.memory_space<vmem>>, vector<1x1xf32>
    %477 = vector.broadcast %476 : vector<1x1xf32> to vector<2x1xf32>
    %478 = arith.addf %475, %477 : vector<2x1xf32>
    %c0_98 = arith.constant 0 : index
    %c0_99 = arith.constant 0 : index
    %479 = vector.load %arg10[%c0_98, %c0_99] : memref<2x1xf32, #tpu.memory_space<vmem>>, vector<2x1xf32>
    tpu.vector_store %arg10[%c0_98, %c0_99], %478 {strides = array<i32>} : memref<2x1xf32, #tpu.memory_space<vmem>>, vector<2x1xf32>,
    return
  }
  func.func @transform_0(%arg0: i32) -> (i32, i32) {
    %c0_i32 = arith.constant 0 : i32
    %c0_i32_0 = arith.constant 0 : i32
    %c0_i32_1 = arith.constant 0 : i32
    return %c0_i32, %c0_i32_0 : i32, i32
  }
  func.func @transform_1(%arg0: i32) -> (i32, i32) {
    %c0_i32 = arith.constant 0 : i32
    %c0_i32_0 = arith.constant 0 : i32
    %c0_i32_1 = arith.constant 0 : i32
    return %c0_i32, %c0_i32_0 : i32, i32
  }
  func.func @transform_2(%arg0: i32) -> (i32, i32) {
    %c0_i32 = arith.constant 0 : i32
    %c0_i32_0 = arith.constant 0 : i32
    %c0_i32_1 = arith.constant 0 : i32
    return %c0_i32, %c0_i32_0 : i32, i32
  }
  func.func @transform_3(%arg0: i32) -> (i32, i32) {
    %c0_i32 = arith.constant 0 : i32
    %c0_i32_0 = arith.constant 0 : i32
    %c0_i32_1 = arith.constant 0 : i32
    return %c0_i32, %c0_i32_0 : i32, i32
  }
  func.func @transform_4(%arg0: i32) -> (i32, i32) {
    %c0_i32 = arith.constant 0 : i32
    %c0_i32_0 = arith.constant 0 : i32
    %c0_i32_1 = arith.constant 0 : i32
    return %c0_i32, %c0_i32_0 : i32, i32
  }
  func.func @transform_5(%arg0: i32) -> (i32, i32) {
    %c0_i32 = arith.constant 0 : i32
    %c0_i32_0 = arith.constant 0 : i32
    %c0_i32_1 = arith.constant 0 : i32
    return %c0_i32, %c0_i32_0 : i32, i32
  }
  func.func @transform_6(%arg0: i32) -> (i32, i32) {
    %c0_i32 = arith.constant 0 : i32
    %c0_i32_0 = arith.constant 0 : i32
    %c0_i32_1 = arith.constant 0 : i32
    return %c0_i32, %c0_i32_0 : i32, i32
  }
  func.func @transform_7(%arg0: i32) -> (i32, i32) {
    %c0_i32 = arith.constant 0 : i32
    %c0_i32_0 = arith.constant 0 : i32
    %c0_i32_1 = arith.constant 0 : i32
    return %c0_i32, %c0_i32_0 : i32, i32
  }
  func.func @transform_8(%arg0: i32) -> (i32, i32) {
    %c0_i32 = arith.constant 0 : i32
    %c0_i32_0 = arith.constant 0 : i32
    %c0_i32_1 = arith.constant 0 : i32
    return %c0_i32, %c0_i32_0 : i32, i32
  }
  func.func @transform_9(%arg0: i32) -> (i32, i32) {
    %c0_i32 = arith.constant 0 : i32
    %c0_i32_0 = arith.constant 0 : i32
    %c0_i32_1 = arith.constant 0 : i32
    return %c0_i32, %c0_i32_0 : i32, i32
  }
}

</mosaic_0001>

<bundles_post_ra>
// kernel: tpu_custom_call.1
= control target key start
LH: loop header
LB: loop body
LE: loop exit
PB: predicated region body
PF: predicated region fallthrough
CT: control target
= control target key end

     0   :  { %s3053_s0 = inlined_call_operand.vmem [shape: f32[16,6], index: 0, kind: input, shape index: {}]   ;;  %s3054_s1 = inlined_call_operand.hbm [shape: f32[6,128], index: 1, kind: input, shape index: {}]   ;;  %s3055_s2 = inlined_call_operand.vmem [shape: f32[32,128], index: 2, kind: input, shape index: {}]   ;;  %s3056_s3 = inlined_call_operand.hbm [shape: f32[1,128], index: 3, kind: input, shape index: {}]   ;;  %s3057_s4 = inlined_call_operand.vmem [shape: f32[32,128], index: 4, kind: input, shape index: {}]   ;;  %s3058_s5 = inlined_call_operand.hbm [shape: f32[32,128], index: 5, kind: input, shape index: {}]   ;;  %s3059_s6 = inlined_call_operand.vmem [shape: f32[1,128], index: 6, kind: input, shape index: {}]   ;;  %s3060_s7 = inlined_call_operand.vmem [shape: f32[32,1], index: 7, kind: input, shape index: {}]   ;;  %s3061_s8 = inlined_call_operand.<no memory space> [shape: f32[1,1], index: 8, kind: input, shape index: {}]   ;;  %s3062_s9 = inlined_call_operand.vmem [shape: f32[2,1], index: 9, kind: output, shape index: {}]  }
   0x1   :  { %v14_v0 = vstv %s3061_s8 }
   0x2   :  { %15 = vst [vmem:[#allocation3] sm:$0x1] %v14_v0 }
   0x3   :  { %16 = vsyncpa [#allocation5], 0 }
   0x4   :  { %17 = vsyncpa [#allocation7], 0  ;;  %s2616_s11 = smov [#allocation6]   ;;  %s2617_s13 = smov [#allocation4]  }
   0x5   :  { %s38_s12 = sshll.u32 %s2616_s11, 4  ;;  %s26_s14 = sshll.u32 %s2617_s13, 4  ;;  %s39_s12 = int_to_ptr.vmem [resolvable:$true] %s38_s12  ;;  %s27_s14 = int_to_ptr.vmem [resolvable:$true] %s26_s14 }
   0x6   :  { %s2560_s15 = scalar_lea.vmem %s39_s12, 16  ;;  %s2564_s16 = scalar_lea.vmem %s39_s12, 32 }
   0x7   :  { %p2561_p0 = scmp.ne.s32.totalorder %s39_s12, %s2560_s15  ;;  %p2565_p1 = scmp.lt.s32.totalorder %s39_s12, %s39_s12 }
   0x8   :  { %p2566_p2 = scmp.lt.s32.totalorder %s2564_s16, %s2560_s15 }
   0xa   :  { %p2567_p3 = por %p2566_p2, %p2565_p1 }
   0xc   :  { %p2568_p4 = pnand %p2567_p3, %p2561_p0 }
   0xe   :  { %2571 = shalt.err (!%p2568_p4)
}
   0xf   :  { %41 = dma.hbm_to_vmem [thread:$0]  %s3056_s3, 16, %s39_s12, [#allocation7]  }
  0x10   :  { %s2580_s8 = scalar_lea.vmem %s27_s14, 128  ;;  %p2585_p6 = scmp.lt.s32.totalorder %s27_s14, %s27_s14 }
  0x11   :  { %p2581_p5 = scmp.ne.s32.totalorder %s27_s14, %s2580_s8  ;;  %p2586_p7 = scmp.lt.s32.totalorder %s2580_s8, %s2580_s8 }
  0x13   :  { %p2587_p8 = por %p2586_p7, %p2585_p6 }
  0x15   :  { %p2588_p9 = pnand %p2587_p8, %p2581_p5 }
  0x17   :  { %2591 = shalt.err (!%p2588_p9)
}
  0x18   :  { %29 = dma.hbm_to_vmem [thread:$0]  %s3054_s1, 128, %s27_s14, [#allocation5]  }
  0x19   :  { %s2618_s21 = smov [#allocation8]  }
  0x1a   :  { %s49_s22 = sshll.u32 %s2618_s21, 4  ;;  %s50_s22 = int_to_ptr.vmem [resolvable:$true] %s49_s22 }
  0x1b   :  { %s2600_s23 = scalar_lea.vmem %s50_s22, 512  ;;  %p2605_p11 = scmp.lt.s32.totalorder %s50_s22, %s50_s22 }
  0x1c   :  { %p2601_p10 = scmp.ne.s32.totalorder %s50_s22, %s2600_s23  ;;  %p2606_p12 = scmp.lt.s32.totalorder %s2600_s23, %s2600_s23 }
  0x1e   :  { %p2607_p13 = por %p2606_p12, %p2605_p11 }
  0x20   :  { %p2608_p0 = pnand %p2607_p13, %p2601_p10 }
  0x22   :  { %2611 = shalt.err (!%p2608_p0)
}
  0x23   :  { %s2619_s3 = smov 128   ;;  %s2620_s24 = smov 8  }
  0x24   :  { %55 = dma.hbm_to_vmem [thread:$0]  %s3058_s5, 512, %s50_s22, [#allocation7], %s2619_s3, %s2619_s3, %s2620_s24  }
  0x25   :  { %2612 = dma.done.wait [#allocation5], 128  }
  0x26   :  { %2613 = vsyncadd [#allocation5], 4294967168 }
  0x27   :  { %2614 = dma.done.wait [#allocation7], 528  }
  0x28   :  { %2615 = vsyncadd [#allocation7], 4294966768  ;;  %v2621_v1 = vmov 0.0   ;;  %vm2622_vm0 = vmmov 0   ;;  %vm88_vm1 = vcmask 1045504   ;;  %vm81_vm2 = vcmask 48128  }
  0x29   :  { %2217 = vmatprep.subr.mxu1 %v2621_v1  ;;  %2225 = vmatprep.mubr.msk.f32.mxu1 %vm2622_vm0, %v2621_v1  ;;  %v73_v2 = vld [vmem:[#allocation4] sm:$0x3f]  ;;  %v2693_v3 = vld [vmem:[%s3055_s2 + $0x18] sm:$0xff]  ;;  %v71_v4 = vld [vmem:[%s3053_s0] sm:$0xff]  ;;  %s2624_s15 = smov 32   ;;  %vm274_vm3 = vcmask 254976  }
  0x2a   :  { %2212 = vmatprep.subr.msk.mxu0 %vm88_vm1, %v73_v2  ;;  %2218 = vmatpush3.msra.mxu1 %v2693_v3  ;;  %v72_v5 = vld [vmem:[%s3053_s0 + $0x8] sm:$0xff]  ;;  %v2705_v6 = vld [vmem:[%s3055_s2 + $0x10] sm:$0xff]  ;;  %v2719_v8 = vld [vmem:[%s3055_s2] sm:$0xff]  ;;  %vm171_vm4 = vcmask 261120   ;;  %vm383_vm5 = vcmask 257026   ;;  %vm607_vm6 = vcmask 261126  }
  0x2b   :  { %2213 = vmatpush3.msk.msra.mxu0 %vm88_vm1, %v73_v2  ;;  %2214 = vmatprep.mubr.msk.f32.mxu0 %vm81_vm2, %v71_v4  ;;  %v2711_v7 = vld [vmem:[%s3055_s2 + $0x8] sm:$0xff]  ;;  %v2079_v9 = vld [vmem:[#allocation6] ss:$0 sm:$0xff]  ;;  %s2623_s2 = smov 64   ;;  %vm495_vm7 = vcmask 259076   ;;  %vm2071_vm8 = vcmask 1024  }
  0x2c   :  { %2219 = vmatprep.subr.mxu1 %v2621_v1  ;;  %2215 = vmatmul.mubr.msk.f32.vlgmr.msra.gmra.mxu0 %vm81_vm2, %v72_v5 }
  0x2d   :  { %2220 = vmatpush3.msra.mxu1 %v2705_v6  ;;  %2228 = vmatprep.subr.mxu0 %v2621_v1 }
  0x2e   :  { %2221 = vmatprep.subr.mxu1 %v2621_v1  ;;  %2229 = vmatpush3.msra.mxu0 %v2693_v3 }
  0x2f   :  { %2222 = vmatpush3.msra.mxu1 %v2711_v7  ;;  %2230 = vmatprep.subr.mxu0 %v2621_v1 }
  0x30   :  { %2223 = vmatprep.subr.mxu1 %v2621_v1  ;;  %2231 = vmatpush3.msra.mxu0 %v2705_v6 }
  0x31   :  { %2224 = vmatpush3.msra.mxu1 %v2719_v8  ;;  %2232 = vmatprep.subr.mxu0 %v2621_v1 }
  0x32   :  { %2226 = vmatmul.mubr.f32.vlgmr.msra.gmra.mxu1 %v2621_v1  ;;  %2233 = vmatpush3.msra.mxu0 %v2711_v7 }
  0x33   :  { %2234 = vmatprep.subr.mxu0 %v2621_v1  ;;  %2236 = vmatprep.mubr.msk.f32.mxu0 %vm2622_vm0, %v2621_v1 }
  0x34   :  { %2235 = vmatpush3.msra.mxu0 %v2719_v8  ;;  %2239 = vmatprep.subr.mxu1 %v2621_v1 }
  0x35   :  { %2240 = vmatpush3.msra.mxu1 %v2693_v3  ;;  %2247 = vmatprep.mubr.msk.f32.mxu1 %vm2622_vm0, %v2621_v1 }
  0x36   :  { %2241 = vmatprep.subr.mxu1 %v2621_v1  ;;  %2250 = vmatprep.subr.mxu0 %v2621_v1 }
  0x37   :  { %2242 = vmatpush3.msra.mxu1 %v2705_v6 }
  0x38   :  { %2243 = vmatprep.subr.mxu1 %v2621_v1 }
  0x39   :  { %2244 = vmatpush3.msra.mxu1 %v2711_v7 }
  0x3a   :  { %2245 = vmatprep.subr.mxu1 %v2621_v1 }
  0x3b   :  { %2246 = vmatpush3.msra.mxu1 %v2719_v8 }
  0x3c   :  { %2261 = vmatprep.subr.mxu1 %v2621_v1 }
  0xec   :  { %v2216_v10 = vpop.f32.mrf.mxu0 }
  0xed   :  { %v2746_v11 = vadd.f32 %v2216_v10, %v2079_v9 }
  0xee   :  { %v158_v12 = vpop.f32.mrf.mxu0 }
  0xef   :  { %v2748_v13 = vadd.f32 %v2079_v9, %v158_v12 }
  0xf2   :  { %v241_v14 = vpop.f32.mrf.mxu1 }
  0xf3   :  { %v245_v15 = vadd.f32 %v241_v14, %v2748_v13 }
  0xf4   :  { %v2227_v16 = vpop.f32.mrf.mxu1 }
  0xf5   :  { %2424 = vtanh.f32 %v245_v15  ;;  %v2083_v18 = vmul.f32 -1.442695, %v245_v15 }
  0xf7   :  { %2426 = vpow2.f32 %v2083_v18 }
 0x102   :  { %v2425_v17 = vpop.eup %2424 }
 0x103   :  { %255 = vrot.lane.b32.xlu0 %v2425_v17, %s2623_s2 }
 0x104   :  { %v2427_v19 = vpop.eup %2426 }
 0x105   :  { %v249_v20 = vadd.f32 1.0, %v2427_v19 }
 0x107   :  { %2428 = vrcp.f32 %v249_v20 }
 0x114   :  { %v2429_v21 = vpop.eup %2428 }
 0x115   :  { %v253_v24 = vmul.f32 0.0, %v2429_v21 }
 0x175   :  { %v256_v22 = vpop.permute.xlu0 %255 }
 0x176   :  { %v258_v23 = vmul.f32 %v2429_v21, %v256_v22 }
 0x178   :  { %260 = vrot.lane.b32.xlu0 %v258_v23, %s2624_s15 }
 0x1ea   :  { %v261_v25 = vpop.permute.xlu0 %260 }
 0x1eb   :  { %v263_v26 = vadd.f32 %v261_v25, %v253_v24 }
 0x1ed   :  { %2430 = vtanh.f32 %v263_v26  ;;  %v360_v42 = vrot.slane %v263_v26, 6 }
 0x1fa   :  { %v2431_v27 = vpop.eup %2430 }
 0x1fb   :  { %266 = vrot.lane.b32.xlu1 %v2431_v27, %s2623_s2 }
 0x26d   :  { %v267_v28 = vpop.permute.xlu1 %266 }
 0x26e   :  { %v269_v29 = vmul.f32 %v2429_v21, %v267_v28 }
 0x270   :  { %271 = vrot.lane.b32.xlu1 %v269_v29, %s2624_s15 }
 0x2e2   :  { %v272_v30 = vpop.permute.xlu1 %271 }
 0x2e3   :  { %275 = vst.msk [vmem:[#allocation2] sm:$0x3] %vm274_vm3, %v272_v30  ;;  %2237 = vmatmul.mubr.msk.f32.vlgmr.msra.gmra.mxu0 %vm171_vm4, %v272_v30 }
 0x2e4   :  { %2251 = vmatpush3.msra.mxu0 %v2693_v3  ;;  %2258 = vmatprep.mubr.msk.f32.mxu0 %vm2622_vm0, %v2621_v1 }
 0x2e5   :  { %2252 = vmatprep.subr.mxu0 %v2621_v1 }
 0x2e6   :  { %2253 = vmatpush3.msra.mxu0 %v2705_v6 }
 0x2e7   :  { %2254 = vmatprep.subr.mxu0 %v2621_v1 }
 0x2e8   :  { %2255 = vmatpush3.msra.mxu0 %v2711_v7 }
 0x2e9   :  { %2256 = vmatprep.subr.mxu0 %v2621_v1 }
 0x2ea   :  { %2257 = vmatpush3.msra.mxu0 %v2719_v8 }
 0x2eb   :  { %2272 = vmatprep.subr.mxu0 %v2621_v1 }
 0x3a3   :  { %v344_v31 = vpop.f32.mrf.mxu0 }
 0x3a4   :  { %v349_v32 = vrot.slane %v344_v31, 6 }
 0x3a5   :  { %v2238_v33 = vpop.f32.mrf.mxu0 }
 0x3a6   :  { %v351_v34 = vadd.f32 %v349_v32, %v2748_v13 }
 0x3a8   :  { %2432 = vtanh.f32 %v351_v34  ;;  %v2085_v36 = vmul.f32 -1.442695, %v351_v34 }
 0x3aa   :  { %2434 = vpow2.f32 %v2085_v36 }
 0x3b5   :  { %v2433_v35 = vpop.eup %2432 }
 0x3b6   :  { %364 = vrot.lane.b32.xlu0 %v2433_v35, %s2623_s2 }
 0x3b7   :  { %v2435_v37 = vpop.eup %2434 }
 0x3b8   :  { %v355_v38 = vadd.f32 1.0, %v2435_v37 }
 0x3ba   :  { %2436 = vrcp.f32 %v355_v38 }
 0x3c7   :  { %v2437_v39 = vpop.eup %2436 }
 0x3c8   :  { %v362_v43 = vmul.f32 %v2437_v39, %v360_v42 }
 0x428   :  { %v365_v40 = vpop.permute.xlu0 %364 }
 0x429   :  { %v367_v41 = vmul.f32 %v2437_v39, %v365_v40 }
 0x42b   :  { %369 = vrot.lane.b32.xlu1 %v367_v41, %s2624_s15 }
 0x49d   :  { %v370_v44 = vpop.permute.xlu1 %369 }
 0x49e   :  { %v372_v45 = vadd.f32 %v370_v44, %v362_v43 }
 0x4a0   :  { %2438 = vtanh.f32 %v372_v45  ;;  %v472_v62 = vrot.slane %v372_v45, 6 }
 0x4ad   :  { %v2439_v46 = vpop.eup %2438 }
 0x4ae   :  { %375 = vrot.lane.b32.xlu0 %v2439_v46, %s2623_s2 }
 0x520   :  { %v376_v47 = vpop.permute.xlu0 %375 }
 0x521   :  { %v2771_v48 = vmul.f32 %v2437_v39, %v376_v47 }
 0x523   :  { %v385_v49 = vrot.slane %v2771_v48, 2 }
 0x525   :  { %386 = vrot.lane.b32.xlu1 %v385_v49, %s2624_s15 }
 0x597   :  { %v387_v50 = vpop.permute.xlu1 %386 }
 0x598   :  { %2248 = vmatmul.mubr.msk.f32.vlgmr.msra.gmra.mxu1 %vm171_vm4, %v387_v50 }
 0x599   :  { %2262 = vmatpush3.msra.mxu1 %v2693_v3  ;;  %2269 = vmatprep.mubr.msk.f32.mxu1 %vm2622_vm0, %v2621_v1 }
 0x59a   :  { %2263 = vmatprep.subr.mxu1 %v2621_v1 }
 0x59b   :  { %2264 = vmatpush3.msra.mxu1 %v2705_v6 }
 0x59c   :  { %2265 = vmatprep.subr.mxu1 %v2621_v1 }
 0x59d   :  { %2266 = vmatpush3.msra.mxu1 %v2711_v7 }
 0x59e   :  { %2267 = vmatprep.subr.mxu1 %v2621_v1 }
 0x59f   :  { %2268 = vmatpush3.msra.mxu1 %v2719_v8 }
 0x5a0   :  { %2283 = vmatprep.subr.mxu1 %v2621_v1 }
 0x658   :  { %v456_v51 = vpop.f32.mrf.mxu1 }
 0x659   :  { %v461_v52 = vrot.slane %v456_v51, 4 }
 0x65a   :  { %v2249_v53 = vpop.f32.mrf.mxu1 }
 0x65b   :  { %v463_v54 = vadd.f32 %v461_v52, %v2748_v13 }
 0x65d   :  { %2440 = vtanh.f32 %v463_v54  ;;  %v2087_v56 = vmul.f32 -1.442695, %v463_v54 }
 0x65f   :  { %2442 = vpow2.f32 %v2087_v56 }
 0x66a   :  { %v2441_v55 = vpop.eup %2440 }
 0x66b   :  { %476 = vrot.lane.b32.xlu0 %v2441_v55, %s2623_s2 }
 0x66c   :  { %v2443_v57 = vpop.eup %2442 }
 0x66d   :  { %v467_v58 = vadd.f32 1.0, %v2443_v57 }
 0x66f   :  { %2444 = vrcp.f32 %v467_v58 }
 0x67c   :  { %v2445_v59 = vpop.eup %2444 }
 0x67d   :  { %v474_v63 = vmul.f32 %v2445_v59, %v472_v62 }
 0x6dd   :  { %v477_v60 = vpop.permute.xlu0 %476 }
 0x6de   :  { %v479_v61 = vmul.f32 %v2445_v59, %v477_v60 }
 0x6e0   :  { %481 = vrot.lane.b32.xlu1 %v479_v61, %s2624_s15 }
 0x752   :  { %v482_v0 = vpop.permute.xlu1 %481 }
 0x753   :  { %v484_v2 = vadd.f32 %v482_v0, %v474_v63 }
 0x755   :  { %2446 = vtanh.f32 %v484_v2  ;;  %v584_v25 = vrot.slane %v484_v2, 6 }
 0x762   :  { %v2447_v4 = vpop.eup %2446 }
 0x763   :  { %487 = vrot.lane.b32.xlu0 %v2447_v4, %s2623_s2 }
 0x7d5   :  { %v488_v5 = vpop.permute.xlu0 %487 }
 0x7d6   :  { %v2790_v9 = vmul.f32 %v2445_v59, %v488_v5 }
 0x7d8   :  { %v497_v10 = vrot.slane %v2790_v9, 4 }
 0x7da   :  { %498 = vrot.lane.b32.xlu1 %v497_v10, %s2624_s15 }
 0x84c   :  { %v499_v12 = vpop.permute.xlu1 %498 }
 0x84d   :  { %2259 = vmatmul.mubr.msk.f32.vlgmr.msra.gmra.mxu0 %vm171_vm4, %v499_v12 }
 0x84e   :  { %2273 = vmatpush3.msra.mxu0 %v2693_v3  ;;  %2280 = vmatprep.mubr.msk.f32.mxu0 %vm2622_vm0, %v2621_v1 }
 0x84f   :  { %2274 = vmatprep.subr.mxu0 %v2621_v1 }
 0x850   :  { %2275 = vmatpush3.msra.mxu0 %v2705_v6 }
 0x851   :  { %2276 = vmatprep.subr.mxu0 %v2621_v1 }
 0x852   :  { %2277 = vmatpush3.msra.mxu0 %v2711_v7 }
 0x853   :  { %2278 = vmatprep.subr.mxu0 %v2621_v1 }
 0x854   :  { %2279 = vmatpush3.msra.mxu0 %v2719_v8 }
 0x855   :  { %2294 = vmatprep.subr.mxu0 %v2621_v1 }
 0x90d   :  { %v568_v14 = vpop.f32.mrf.mxu0 }
 0x90e   :  { %v573_v15 = vrot.slane %v568_v14, 2 }
 0x90f   :  { %v2260_v16 = vpop.f32.mrf.mxu0 }
 0x910   :  { %v575_v17 = vadd.f32 %v573_v15, %v2748_v13 }
 0x912   :  { %2448 = vtanh.f32 %v575_v17  ;;  %v2089_v19 = vmul.f32 -1.442695, %v575_v17 }
 0x914   :  { %2450 = vpow2.f32 %v2089_v19 }
 0x91f   :  { %v2449_v18 = vpop.eup %2448 }
 0x920   :  { %588 = vrot.lane.b32.xlu0 %v2449_v18, %s2623_s2 }
 0x921   :  { %v2451_v20 = vpop.eup %2450 }
 0x922   :  { %v579_v21 = vadd.f32 1.0, %v2451_v20 }
 0x924   :  { %2452 = vrcp.f32 %v579_v21 }
 0x931   :  { %v2453_v22 = vpop.eup %2452 }
 0x932   :  { %v586_v26 = vmul.f32 %v2453_v22, %v584_v25 }
 0x992   :  { %v589_v23 = vpop.permute.xlu0 %588 }
 0x993   :  { %v591_v24 = vmul.f32 %v2453_v22, %v589_v23 }
 0x995   :  { %593 = vrot.lane.b32.xlu1 %v591_v24, %s2624_s15 }
 0xa07   :  { %v594_v27 = vpop.permute.xlu1 %593 }
 0xa08   :  { %v596_v28 = vadd.f32 %v594_v27, %v586_v26 }
 0xa0a   :  { %2454 = vtanh.f32 %v596_v28  ;;  %v693_v43 = vrot.slane %v596_v28, 6 }
 0xa17   :  { %v2455_v13 = vpop.eup %2454 }
 0xa18   :  { %599 = vrot.lane.b32.xlu0 %v2455_v13, %s2623_s2 }
 0xa8a   :  { %v600_v29 = vpop.permute.xlu0 %599 }
 0xa8b   :  { %v2809_v30 = vmul.f32 %v2453_v22, %v600_v29 }
 0xa8d   :  { %v609_v31 = vrot.slane %v2809_v30, 6 }
 0xa8f   :  { %610 = vrot.lane.b32.xlu1 %v609_v31, %s2624_s15 }
 0xb01   :  { %v611_v32 = vpop.permute.xlu1 %610 }
 0xb02   :  { %2270 = vmatmul.mubr.msk.f32.vlgmr.msra.gmra.mxu1 %vm171_vm4, %v611_v32 }
 0xb03   :  { %2284 = vmatpush3.msra.mxu1 %v2693_v3  ;;  %2291 = vmatprep.mubr.msk.f32.mxu1 %vm2622_vm0, %v2621_v1 }
 0xb04   :  { %2285 = vmatprep.subr.mxu1 %v2621_v1 }
 0xb05   :  { %2286 = vmatpush3.msra.mxu1 %v2705_v6 }
 0xb06   :  { %2287 = vmatprep.subr.mxu1 %v2621_v1 }
 0xb07   :  { %2288 = vmatpush3.msra.mxu1 %v2711_v7 }
 0xb08   :  { %2289 = vmatprep.subr.mxu1 %v2621_v1 }
 0xb09   :  { %2290 = vmatpush3.msra.mxu1 %v2719_v8 }
 0xbc2   :  { %v680_v33 = vpop.f32.mrf.mxu1 }
 0xbc3   :  { %v684_v34 = vadd.f32 %v680_v33, %v2746_v11 }
 0xbc4   :  { %v2271_v35 = vpop.f32.mrf.mxu1 }
 0xbc5   :  { %2456 = vtanh.f32 %v684_v34  ;;  %v2091_v37 = vmul.f32 -1.442695, %v684_v34 }
 0xbc7   :  { %2458 = vpow2.f32 %v2091_v37 }
 0xbd2   :  { %v2457_v36 = vpop.eup %2456 }
 0xbd3   :  { %697 = vrot.lane.b32.xlu0 %v2457_v36, %s2623_s2 }
 0xbd4   :  { %v2459_v38 = vpop.eup %2458 }
 0xbd5   :  { %v688_v39 = vadd.f32 1.0, %v2459_v38 }
 0xbd7   :  { %2460 = vrcp.f32 %v688_v39 }
 0xbe4   :  { %v2461_v40 = vpop.eup %2460 }
 0xbe5   :  { %v695_v44 = vmul.f32 %v2461_v40, %v693_v43 }
 0xc45   :  { %v698_v41 = vpop.permute.xlu0 %697 }
 0xc46   :  { %v700_v42 = vmul.f32 %v2461_v40, %v698_v41 }
 0xc48   :  { %702 = vrot.lane.b32.xlu1 %v700_v42, %s2624_s15 }
 0xcba   :  { %v703_v45 = vpop.permute.xlu1 %702 }
 0xcbb   :  { %v705_v46 = vadd.f32 %v703_v45, %v695_v44 }
 0xcbd   :  { %2462 = vtanh.f32 %v705_v46 }
 0xcca   :  { %v2463_v47 = vpop.eup %2462 }
 0xccb   :  { %708 = vrot.lane.b32.xlu0 %v2463_v47, %s2623_s2 }
 0xd3d   :  { %v709_v49 = vpop.permute.xlu0 %708 }
 0xd3e   :  { %v711_v50 = vmul.f32 %v2461_v40, %v709_v49  ;;  %v1052_v49 = vld [vmem:[%s3057_s4 + $0x18] sm:$0xff] }
 0xd3f   :  { %2305 = vmatprep.subr.mxu1 %v1052_v49 }
 0xd40   :  { %713 = vrot.lane.b32.xlu1 %v711_v50, %s2624_s15  ;;  %v1051_v50 = vld [vmem:[%s3057_s4 + $0x10] sm:$0xff] }
 0xdb2   :  { %v714_v51 = vpop.permute.xlu1 %713 }
 0xdb3   :  { %716 = vst.msk [vmem:[#allocation2 + $0x8] sm:$0x3] %vm274_vm3, %v714_v51  ;;  %2281 = vmatmul.mubr.msk.f32.vlgmr.msra.gmra.mxu0 %vm171_vm4, %v714_v51  ;;  %v2879_v51 = vld [vmem:[#allocation8 + $0x18] sm:$0xff] }
 0xdb4   :  { %2295 = vmatpush3.msra.mxu0 %v2693_v3  ;;  %2302 = vmatprep.mubr.msk.f32.mxu0 %vm2622_vm0, %v2621_v1 }
 0xdb5   :  { %2296 = vmatprep.subr.mxu0 %v2621_v1 }
 0xdb6   :  { %2297 = vmatpush3.msra.mxu0 %v2705_v6 }
 0xdb7   :  { %2298 = vmatprep.subr.mxu0 %v2621_v1 }
 0xdb8   :  { %2299 = vmatpush3.msra.mxu0 %v2711_v7 }
 0xdb9   :  { %2300 = vmatprep.subr.mxu0 %v2621_v1 }
 0xdba   :  { %2301 = vmatpush3.msra.mxu0 %v2719_v8  ;;  %v801_v8 = vrot.slane %v705_v46, 6 }
 0xdbb   :  { %2316 = vmatprep.subr.mxu0 %v2621_v1 }
 0xe73   :  { %v785_v52 = vpop.f32.mrf.mxu0 }
 0xe74   :  { %v790_v53 = vrot.slane %v785_v52, 6  ;;  %v2885_v52 = vld [vmem:[#allocation8 + $0x10] sm:$0xff] }
 0xe75   :  { %v2282_v3 = vpop.f32.mrf.mxu0 }
 0xe76   :  { %v792_v54 = vadd.f32 %v790_v53, %v2746_v11  ;;  %v2888_v53 = vld [vmem:[#allocation8 + $0x8] sm:$0xff] }
 0xe77   :  { %v1049_v3 = vld [vmem:[%s3057_s4] sm:$0xff] }
 0xe78   :  { %2464 = vtanh.f32 %v792_v54  ;;  %v2093_v6 = vmul.f32 -1.442695, %v792_v54  ;;  %v2897_v54 = vld [vmem:[#allocation8] sm:$0xff] }
 0xe7a   :  { %2466 = vpow2.f32 %v2093_v6 }
 0xe85   :  { %v2465_v55 = vpop.eup %2464 }
 0xe86   :  { %805 = vrot.lane.b32.xlu0 %v2465_v55, %s2623_s2 }
 0xe87   :  { %v2467_v56 = vpop.eup %2466 }
 0xe88   :  { %v796_v57 = vadd.f32 1.0, %v2467_v56 }
 0xe8a   :  { %2468 = vrcp.f32 %v796_v57 }
 0xe97   :  { %v2469_v7 = vpop.eup %2468 }
 0xe98   :  { %v803_v60 = vmul.f32 %v2469_v7, %v801_v8 }
 0xef8   :  { %v806_v58 = vpop.permute.xlu0 %805 }
 0xef9   :  { %v808_v59 = vmul.f32 %v2469_v7, %v806_v58 }
 0xefb   :  { %810 = vrot.lane.b32.xlu1 %v808_v59, %s2624_s15 }
 0xf6d   :  { %v811_v61 = vpop.permute.xlu1 %810 }
 0xf6e   :  { %v813_v62 = vadd.f32 %v811_v61, %v803_v60  ;;  %v2098_v61 = vld [vmem:[%s3059_s6] ss:$0 sm:$0xff] }
 0xf70   :  { %2470 = vtanh.f32 %v813_v62  ;;  %v912_v23 = vrot.slane %v813_v62, 6 }
 0xf7d   :  { %v2471_v63 = vpop.eup %2470 }
 0xf7e   :  { %816 = vrot.lane.b32.xlu0 %v2471_v63, %s2623_s2 }
 0xff0   :  { %v817_v0 = vpop.permute.xlu0 %816 }
 0xff1   :  { %v2844_v2 = vmul.f32 %v2469_v7, %v817_v0 }
 0xff3   :  { %v825_v4 = vrot.slane %v2844_v2, 2 }
 0xff5   :  { %826 = vrot.lane.b32.xlu1 %v825_v4, %s2624_s15 }
0x1067   :  { %v827_v5 = vpop.permute.xlu1 %826 }
0x1068   :  { %2292 = vmatmul.mubr.msk.f32.vlgmr.msra.gmra.mxu1 %vm171_vm4, %v827_v5 }
0x1069   :  { %2306 = vmatpush3.msra.mxu1 %v1052_v49 }
0x106a   :  { %2307 = vmatprep.subr.mxu1 %v1051_v50 }
0x106b   :  { %2308 = vmatpush3.msra.mxu1 %v1051_v50 }
0x1128   :  { %v896_v10 = vpop.f32.mrf.mxu1 }
0x1129   :  { %v901_v12 = vrot.slane %v896_v10, 4 }
0x112a   :  { %v2293_v14 = vpop.f32.mrf.mxu1 }
0x112b   :  { %v903_v15 = vadd.f32 %v901_v12, %v2746_v11 }
0x112d   :  { %2472 = vtanh.f32 %v903_v15  ;;  %v2095_v17 = vmul.f32 -1.442695, %v903_v15 }
0x112f   :  { %2474 = vpow2.f32 %v2095_v17 }
0x113a   :  { %v2473_v16 = vpop.eup %2472 }
0x113b   :  { %916 = vrot.lane.b32.xlu0 %v2473_v16, %s2623_s2 }
0x113c   :  { %v2475_v18 = vpop.eup %2474 }
0x113d   :  { %v907_v19 = vadd.f32 1.0, %v2475_v18 }
0x113f   :  { %2476 = vrcp.f32 %v907_v19 }
0x114c   :  { %v2477_v20 = vpop.eup %2476 }
0x114d   :  { %v914_v24 = vmul.f32 %v2477_v20, %v912_v23 }
0x11ad   :  { %v917_v21 = vpop.permute.xlu0 %916 }
0x11ae   :  { %v919_v22 = vmul.f32 %v2477_v20, %v917_v21 }
0x11b0   :  { %921 = vrot.lane.b32.xlu1 %v919_v22, %s2624_s15 }
0x1222   :  { %v922_v25 = vpop.permute.xlu1 %921 }
0x1223   :  { %v924_v26 = vadd.f32 %v922_v25, %v914_v24 }
0x1225   :  { %2478 = vtanh.f32 %v924_v26 }
0x1232   :  { %v2479_v27 = vpop.eup %2478 }
0x1233   :  { %927 = vrot.lane.b32.xlu0 %v2479_v27, %s2623_s2 }
0x12a5   :  { %v928_v28 = vpop.permute.xlu0 %927 }
0x12a6   :  { %v930_v13 = vmul.f32 %v2477_v20, %v928_v28 }
0x12a8   :  { %v936_v29 = vrot.slane %v930_v13, 4 }
0x12aa   :  { %937 = vrot.lane.b32.xlu1 %v936_v29, %s2624_s15 }
0x131c   :  { %v938_v31 = vpop.permute.xlu1 %937 }
0x131d   :  { %2303 = vmatmul.mubr.msk.f32.vlgmr.msra.gmra.mxu0 %vm171_vm4, %v938_v31 }
0x131e   :  { %2324 = vmatprep.mubr.msk.f32.mxu0 %vm2622_vm0, %v2621_v1  ;;  %2317 = vmatpush3.msra.mxu0 %v2879_v51 }
0x131f   :  { %2318 = vmatprep.subr.mxu0 %v2621_v1 }
0x1320   :  { %2319 = vmatpush3.msra.mxu0 %v2885_v52 }
0x1321   :  { %2320 = vmatprep.subr.mxu0 %v2621_v1 }
0x1322   :  { %2321 = vmatpush3.msra.mxu0 %v2888_v53 }
0x1323   :  { %2322 = vmatprep.subr.mxu0 %v2621_v1 }
0x1324   :  { %2323 = vmatpush3.msra.mxu0 %v2897_v54 }
0x1325   :  { %2325 = vmatmul.mubr.f32.vlgmr.msra.gmra.mxu0 %v2621_v1  ;;  %2338 = vmatprep.subr.mxu0 %v2621_v1 }
0x1326   :  { %2339 = vmatpush3.msra.mxu0 %v2879_v51  ;;  %2346 = vmatprep.mubr.msk.f32.mxu0 %vm2622_vm0, %v2621_v1 }
0x1327   :  { %2340 = vmatprep.subr.mxu0 %v2621_v1 }
0x1328   :  { %2341 = vmatpush3.msra.mxu0 %v2885_v52 }
0x1329   :  { %2342 = vmatprep.subr.mxu0 %v2621_v1 }
0x132a   :  { %2343 = vmatpush3.msra.mxu0 %v2888_v53 }
0x132b   :  { %2344 = vmatprep.subr.mxu0 %v2621_v1 }
0x132c   :  { %2345 = vmatpush3.msra.mxu0 %v2897_v54 }
0x132d   :  { %2360 = vmatprep.subr.mxu0 %v2621_v1 }
0x13dd   :  { %v1007_v32 = vpop.f32.mrf.mxu0 }
0x13de   :  { %v1012_v33 = vrot.slane %v1007_v32, 2 }
0x13df   :  { %v2304_v34 = vpop.f32.mrf.mxu0 }
0x13e0   :  { %v1014_v35 = vadd.f32 %v1012_v33, %v2746_v11  ;;  %v1023_v11 = vrot.slane %v924_v26, 6 }
0x13e2   :  { %2480 = vtanh.f32 %v1014_v35  ;;  %v2097_v37 = vmul.f32 -1.442695, %v1014_v35 }
0x13e4   :  { %2482 = vpow2.f32 %v2097_v37 }
0x13e5   :  { %v1211_v8 = vpop.f32.mrf.mxu0 }
0x13e7   :  { %v2326_v60 = vpop.f32.mrf.mxu0 }
0x13ef   :  { %v2481_v36 = vpop.eup %2480 }
0x13f0   :  { %1027 = vrot.lane.b32.xlu0 %v2481_v36, %s2623_s2 }
0x13f1   :  { %v2483_v38 = vpop.eup %2482 }
0x13f2   :  { %v1018_v39 = vadd.f32 1.0, %v2483_v38 }
0x13f4   :  { %2484 = vrcp.f32 %v1018_v39 }
0x1401   :  { %v2485_v40 = vpop.eup %2484 }
0x1402   :  { %v1025_v43 = vmul.f32 %v2485_v40, %v1023_v11 }
0x1462   :  { %v1028_v41 = vpop.permute.xlu0 %1027 }
0x1463   :  { %v1030_v42 = vmul.f32 %v2485_v40, %v1028_v41 }
0x1465   :  { %1032 = vrot.lane.b32.xlu1 %v1030_v42, %s2624_s15 }
0x1469   :  { %380 = vrot.lane.b32.xlu1 %v2771_v48, %s2624_s15 }
0x146d   :  { %604 = vrot.lane.b32.xlu1 %v2809_v30, %s2624_s15 }
0x1471   :  { %932 = vrot.lane.b32.xlu1 %v930_v13, %s2624_s15 }
0x14d7   :  { %v1033_v44 = vpop.permute.xlu1 %1032 }
0x14d8   :  { %v1035_v45 = vadd.f32 %v1033_v44, %v1025_v43 }
0x14da   :  { %2486 = vtanh.f32 %v1035_v45 }
0x14db   :  { %v381_v46 = vpop.permute.xlu1 %380 }
0x14dc   :  { %384 = vst.msk [vmem:[#allocation2] sm:$0xc] %vm383_vm5, %v381_v46 }
0x14df   :  { %v605_v47 = vpop.permute.xlu1 %604 }
0x14e0   :  { %608 = vst.msk [vmem:[#allocation2] sm:$0xc0] %vm607_vm6, %v605_v47 }
0x14e3   :  { %v933_v48 = vpop.permute.xlu1 %932 }
0x14e4   :  { %935 = vst.msk [vmem:[#allocation2 + $0x8] sm:$0x30] %vm495_vm7, %v933_v48 }
0x14e7   :  { %v2487_v30 = vpop.eup %2486 }
0x14e8   :  { %1038 = vrot.lane.b32.xlu0 %v2487_v30, %s2623_s2 }
0x14ec   :  { %492 = vrot.lane.b32.xlu0 %v2790_v9, %s2624_s15  ;;  %v1050_v9 = vld [vmem:[%s3057_s4 + $0x8] sm:$0xff] }
0x14ed   :  { %2309 = vmatprep.subr.mxu1 %v1050_v9 }
0x14ee   :  { %2310 = vmatpush3.msra.mxu1 %v1050_v9 }
0x14ef   :  { %2311 = vmatprep.subr.mxu1 %v1049_v3 }
0x14f0   :  { %821 = vrot.lane.b32.xlu0 %v2844_v2, %s2624_s15  ;;  %2312 = vmatpush3.msra.mxu1 %v1049_v3 }
0x14f1   :  { %2327 = vmatprep.subr.mxu1 %v2621_v1 }
0x155a   :  { %v1039_v55 = vpop.permute.xlu0 %1038 }
0x155b   :  { %v1041_v6 = vmul.f32 %v2485_v40, %v1039_v55 }
0x155d   :  { %1043 = vrot.lane.b32.xlu0 %v1041_v6, %s2624_s15 }
0x155e   :  { %v493_v56 = vpop.permute.xlu0 %492 }
0x155f   :  { %496 = vst.msk [vmem:[#allocation2] sm:$0x30] %vm495_vm7, %v493_v56 }
0x1562   :  { %v822_v57 = vpop.permute.xlu0 %821 }
0x1563   :  { %824 = vst.msk [vmem:[#allocation2 + $0x8] sm:$0xc] %vm383_vm5, %v822_v57 }
0x1566   :  { %v1047_v7 = vld [vmem:[#allocation2] sm:$0xff] }
0x1567   :  { %2313 = vmatprep.mubr.msk.f32.mxu1 %vm171_vm4, %v1047_v7 }
0x15cf   :  { %v1044_v58 = vpop.permute.xlu0 %1043 }
0x15d0   :  { %1046 = vst.msk [vmem:[#allocation2 + $0x8] sm:$0xc0] %vm607_vm6, %v1044_v58 }
0x15d7   :  { %v1048_v59 = vld [vmem:[#allocation2 + $0x8] sm:$0xff] }
0x15d8   :  { %2314 = vmatmul.mubr.msk.f32.vlgmr.msra.gmra.mxu1 %vm171_vm4, %v1048_v59 }
0x15d9   :  { %2328 = vmatpush3.msra.mxu1 %v2879_v51  ;;  %2335 = vmatprep.mubr.msk.f32.mxu1 %vm2622_vm0, %v2621_v1 }
0x15da   :  { %2329 = vmatprep.subr.mxu1 %v2621_v1 }
0x15db   :  { %2330 = vmatpush3.msra.mxu1 %v2885_v52 }
0x15dc   :  { %2331 = vmatprep.subr.mxu1 %v2621_v1 }
0x15dd   :  { %2332 = vmatpush3.msra.mxu1 %v2888_v53 }
0x15de   :  { %2333 = vmatprep.subr.mxu1 %v2621_v1 }
0x15df   :  { %2334 = vmatpush3.msra.mxu1 %v2897_v54 }
0x15e0   :  { %2349 = vmatprep.subr.mxu1 %v2621_v1 }
0x1698   :  { %v2315_v62 = vpop.f32.mrf.mxu1 }
0x1699   :  { %v2932_v63 = vadd.f32 %v2315_v62, %v2098_v61 }
0x169a   :  { %v1132_v0 = vpop.f32.mrf.mxu1 }
0x169b   :  { %v2934_v2 = vadd.f32 %v2098_v61, %v1132_v0 }
0x169d   :  { %v1215_v4 = vadd.f32 %v1211_v8, %v2934_v2 }
0x169f   :  { %2488 = vtanh.f32 %v1215_v4  ;;  %v2101_v10 = vmul.f32 -1.442695, %v1215_v4 }
0x16a1   :  { %2490 = vpow2.f32 %v2101_v10 }
0x16ac   :  { %v2489_v5 = vpop.eup %2488 }
0x16ad   :  { %1225 = vrot.lane.b32.xlu1 %v2489_v5, %s2623_s2 }
0x16ae   :  { %v2491_v12 = vpop.eup %2490 }
0x16af   :  { %v1219_v14 = vadd.f32 1.0, %v2491_v12 }
0x16b1   :  { %2492 = vrcp.f32 %v1219_v14 }
0x16be   :  { %v2493_v15 = vpop.eup %2492 }
0x16bf   :  { %v1223_v18 = vmul.f32 0.0, %v2493_v15 }
0x171f   :  { %v1226_v16 = vpop.permute.xlu1 %1225 }
0x1720   :  { %v1228_v17 = vmul.f32 %v2493_v15, %v1226_v16 }
0x1722   :  { %1230 = vrot.lane.b32.xlu0 %v1228_v17, %s2624_s15 }
0x1794   :  { %v1231_v19 = vpop.permute.xlu0 %1230 }
0x1795   :  { %v1233_v20 = vadd.f32 %v1231_v19, %v1223_v18 }
0x1797   :  { %2494 = vtanh.f32 %v1233_v20  ;;  %v1327_v36 = vrot.slane %v1233_v20, 6 }
0x17a4   :  { %v2495_v21 = vpop.eup %2494 }
0x17a5   :  { %1236 = vrot.lane.b32.xlu1 %v2495_v21, %s2623_s2 }
0x1817   :  { %v1237_v22 = vpop.permute.xlu1 %1236 }
0x1818   :  { %v1239_v23 = vmul.f32 %v2493_v15, %v1237_v22 }
0x181a   :  { %1241 = vrot.lane.b32.xlu0 %v1239_v23, %s2624_s15 }
0x188c   :  { %v1242_v24 = vpop.permute.xlu0 %1241 }
0x188d   :  { %2336 = vmatmul.mubr.msk.f32.vlgmr.msra.gmra.mxu1 %vm171_vm4, %v1242_v24 }
0x188e   :  { %2350 = vmatpush3.msra.mxu1 %v2879_v51  ;;  %2357 = vmatprep.mubr.msk.f32.mxu1 %vm2622_vm0, %v2621_v1 }
0x188f   :  { %2351 = vmatprep.subr.mxu1 %v2621_v1 }
0x1890   :  { %2352 = vmatpush3.msra.mxu1 %v2885_v52 }
0x1891   :  { %2353 = vmatprep.subr.mxu1 %v2621_v1 }
0x1892   :  { %2354 = vmatpush3.msra.mxu1 %v2888_v53 }
0x1893   :  { %2355 = vmatprep.subr.mxu1 %v2621_v1 }
0x1894   :  { %2356 = vmatpush3.msra.mxu1 %v2897_v54 }
0x1895   :  { %2371 = vmatprep.subr.mxu1 %v2621_v1 }
0x194d   :  { %v1311_v25 = vpop.f32.mrf.mxu1 }
0x194e   :  { %v1316_v26 = vrot.slane %v1311_v25, 6 }
0x194f   :  { %v2337_v27 = vpop.f32.mrf.mxu1 }
0x1950   :  { %v1318_v28 = vadd.f32 %v1316_v26, %v2934_v2 }
0x1952   :  { %2496 = vtanh.f32 %v1318_v28  ;;  %v2103_v29 = vmul.f32 -1.442695, %v1318_v28 }
0x1954   :  { %2498 = vpow2.f32 %v2103_v29 }
0x195f   :  { %v2497_v13 = vpop.eup %2496 }
0x1960   :  { %1331 = vrot.lane.b32.xlu1 %v2497_v13, %s2623_s2 }
0x1961   :  { %v2499_v31 = vpop.eup %2498 }
0x1962   :  { %v1322_v32 = vadd.f32 1.0, %v2499_v31 }
0x1964   :  { %2500 = vrcp.f32 %v1322_v32 }
0x1971   :  { %v2501_v33 = vpop.eup %2500 }
0x1972   :  { %v1329_v37 = vmul.f32 %v2501_v33, %v1327_v36 }
0x19d2   :  { %v1332_v34 = vpop.permute.xlu1 %1331 }
0x19d3   :  { %v1334_v35 = vmul.f32 %v2501_v33, %v1332_v34 }
0x19d5   :  { %1336 = vrot.lane.b32.xlu0 %v1334_v35, %s2624_s15 }
0x1a47   :  { %v1337_v38 = vpop.permute.xlu0 %1336 }
0x1a48   :  { %v1339_v39 = vadd.f32 %v1337_v38, %v1329_v37 }
0x1a4a   :  { %2502 = vtanh.f32 %v1339_v39  ;;  %v1434_v6 = vrot.slane %v1339_v39, 6 }
0x1a57   :  { %v2503_v40 = vpop.eup %2502 }
0x1a58   :  { %1342 = vrot.lane.b32.xlu1 %v2503_v40, %s2623_s2 }
0x1aca   :  { %v1343_v41 = vpop.permute.xlu1 %1342 }
0x1acb   :  { %v1345_v42 = vmul.f32 %v2501_v33, %v1343_v41 }
0x1acd   :  { %v1347_v11 = vrot.slane %v1345_v42, 2 }
0x1acf   :  { %1348 = vrot.lane.b32.xlu0 %v1347_v11, %s2624_s15 }
0x1b41   :  { %v1349_v43 = vpop.permute.xlu0 %1348 }
0x1b42   :  { %2347 = vmatmul.mubr.msk.f32.vlgmr.msra.gmra.mxu0 %vm171_vm4, %v1349_v43 }
0x1b43   :  { %2361 = vmatpush3.msra.mxu0 %v2879_v51  ;;  %2368 = vmatprep.mubr.msk.f32.mxu0 %vm2622_vm0, %v2621_v1 }
0x1b44   :  { %2362 = vmatprep.subr.mxu0 %v2621_v1 }
0x1b45   :  { %2363 = vmatpush3.msra.mxu0 %v2885_v52 }
0x1b46   :  { %2364 = vmatprep.subr.mxu0 %v2621_v1 }
0x1b47   :  { %2365 = vmatpush3.msra.mxu0 %v2888_v53 }
0x1b48   :  { %2366 = vmatprep.subr.mxu0 %v2621_v1 }
0x1b49   :  { %2367 = vmatpush3.msra.mxu0 %v2897_v54 }
0x1b4a   :  { %2382 = vmatprep.subr.mxu0 %v2621_v1 }
0x1c02   :  { %v1418_v44 = vpop.f32.mrf.mxu0 }
0x1c03   :  { %v1423_v45 = vrot.slane %v1418_v44, 4 }
0x1c04   :  { %v2348_v46 = vpop.f32.mrf.mxu0 }
0x1c05   :  { %v1425_v47 = vadd.f32 %v1423_v45, %v2934_v2 }
0x1c07   :  { %2504 = vtanh.f32 %v1425_v47  ;;  %v2105_v30 = vmul.f32 -1.442695, %v1425_v47 }
0x1c09   :  { %2506 = vpow2.f32 %v2105_v30 }
0x1c14   :  { %v2505_v48 = vpop.eup %2504 }
0x1c15   :  { %1438 = vrot.lane.b32.xlu1 %v2505_v48, %s2623_s2 }
0x1c16   :  { %v2507_v49 = vpop.eup %2506 }
0x1c17   :  { %v1429_v50 = vadd.f32 1.0, %v2507_v49 }
0x1c19   :  { %2508 = vrcp.f32 %v1429_v50 }
0x1c26   :  { %v2509_v9 = vpop.eup %2508 }
0x1c27   :  { %v1436_v56 = vmul.f32 %v2509_v9, %v1434_v6 }
0x1c87   :  { %v1439_v3 = vpop.permute.xlu1 %1438 }
0x1c88   :  { %v1441_v55 = vmul.f32 %v2509_v9, %v1439_v3 }
0x1c8a   :  { %1443 = vrot.lane.b32.xlu0 %v1441_v55, %s2624_s15 }
0x1cfc   :  { %v1444_v57 = vpop.permute.xlu0 %1443 }
0x1cfd   :  { %v1446_v7 = vadd.f32 %v1444_v57, %v1436_v56 }
0x1cff   :  { %2510 = vtanh.f32 %v1446_v7  ;;  %v1541_v19 = vrot.slane %v1446_v7, 6 }
0x1d0c   :  { %v2511_v58 = vpop.eup %2510 }
0x1d0d   :  { %1449 = vrot.lane.b32.xlu1 %v2511_v58, %s2623_s2 }
0x1d7f   :  { %v1450_v59 = vpop.permute.xlu1 %1449 }
0x1d80   :  { %v1452_v8 = vmul.f32 %v2509_v9, %v1450_v59 }
0x1d82   :  { %v1454_v60 = vrot.slane %v1452_v8, 4 }
0x1d84   :  { %1455 = vrot.lane.b32.xlu0 %v1454_v60, %s2624_s15 }
0x1df6   :  { %v1456_v61 = vpop.permute.xlu0 %1455 }
0x1df7   :  { %2358 = vmatmul.mubr.msk.f32.vlgmr.msra.gmra.mxu1 %vm171_vm4, %v1456_v61 }
0x1df8   :  { %2372 = vmatpush3.msra.mxu1 %v2879_v51  ;;  %2379 = vmatprep.mubr.msk.f32.mxu1 %vm2622_vm0, %v2621_v1 }
0x1df9   :  { %2373 = vmatprep.subr.mxu1 %v2621_v1 }
0x1dfa   :  { %2374 = vmatpush3.msra.mxu1 %v2885_v52 }
0x1dfb   :  { %2375 = vmatprep.subr.mxu1 %v2621_v1 }
0x1dfc   :  { %2376 = vmatpush3.msra.mxu1 %v2888_v53 }
0x1dfd   :  { %2377 = vmatprep.subr.mxu1 %v2621_v1 }
0x1dfe   :  { %2378 = vmatpush3.msra.mxu1 %v2897_v54 }
0x1dff   :  { %2393 = vmatprep.subr.mxu1 %v2621_v1 }
0x1eb7   :  { %v1525_v62 = vpop.f32.mrf.mxu1 }
0x1eb8   :  { %v1530_v0 = vrot.slane %v1525_v62, 2 }
0x1eb9   :  { %v2359_v4 = vpop.f32.mrf.mxu1 }
0x1eba   :  { %v1532_v5 = vadd.f32 %v1530_v0, %v2934_v2 }
0x1ebc   :  { %2512 = vtanh.f32 %v1532_v5  ;;  %v2107_v12 = vmul.f32 -1.442695, %v1532_v5 }
0x1ebe   :  { %2514 = vpow2.f32 %v2107_v12 }
0x1ec9   :  { %v2513_v10 = vpop.eup %2512 }
0x1eca   :  { %1545 = vrot.lane.b32.xlu1 %v2513_v10, %s2623_s2 }
0x1ecb   :  { %v2515_v14 = vpop.eup %2514 }
0x1ecc   :  { %v1536_v15 = vadd.f32 1.0, %v2515_v14 }
0x1ece   :  { %2516 = vrcp.f32 %v1536_v15 }
0x1edb   :  { %v2517_v16 = vpop.eup %2516 }
0x1edc   :  { %v1543_v20 = vmul.f32 %v2517_v16, %v1541_v19 }
0x1f3c   :  { %v1546_v17 = vpop.permute.xlu1 %1545 }
0x1f3d   :  { %v1548_v18 = vmul.f32 %v2517_v16, %v1546_v17 }
0x1f3f   :  { %1550 = vrot.lane.b32.xlu0 %v1548_v18, %s2624_s15 }
0x1fb1   :  { %v1551_v21 = vpop.permute.xlu0 %1550 }
0x1fb2   :  { %v1553_v22 = vadd.f32 %v1551_v21, %v1543_v20 }
0x1fb4   :  { %2518 = vtanh.f32 %v1553_v22  ;;  %v1645_v37 = vrot.slane %v1553_v22, 6 }
0x1fc1   :  { %v2519_v2 = vpop.eup %2518 }
0x1fc2   :  { %1556 = vrot.lane.b32.xlu1 %v2519_v2, %s2623_s2 }
0x2034   :  { %v1557_v23 = vpop.permute.xlu1 %1556 }
0x2035   :  { %v1559_v24 = vmul.f32 %v2517_v16, %v1557_v23 }
0x2037   :  { %v1561_v25 = vrot.slane %v1559_v24, 6 }
0x2039   :  { %1562 = vrot.lane.b32.xlu0 %v1561_v25, %s2624_s15 }
0x20ab   :  { %v1563_v26 = vpop.permute.xlu0 %1562 }
0x20ac   :  { %2369 = vmatmul.mubr.msk.f32.vlgmr.msra.gmra.mxu0 %vm171_vm4, %v1563_v26 }
0x20ad   :  { %2383 = vmatpush3.msra.mxu0 %v2879_v51  ;;  %2390 = vmatprep.mubr.msk.f32.mxu0 %vm2622_vm0, %v2621_v1 }
0x20ae   :  { %2384 = vmatprep.subr.mxu0 %v2621_v1 }
0x20af   :  { %2385 = vmatpush3.msra.mxu0 %v2885_v52 }
0x20b0   :  { %2386 = vmatprep.subr.mxu0 %v2621_v1 }
0x20b1   :  { %2387 = vmatpush3.msra.mxu0 %v2888_v53 }
0x20b2   :  { %2388 = vmatprep.subr.mxu0 %v2621_v1 }
0x20b3   :  { %2389 = vmatpush3.msra.mxu0 %v2897_v54 }
0x20b4   :  { %2404 = vmatprep.subr.mxu0 %v2621_v1 }
0x216c   :  { %v1632_v27 = vpop.f32.mrf.mxu0 }
0x216d   :  { %v1636_v28 = vadd.f32 %v1632_v27, %v2932_v63 }
0x216e   :  { %v2370_v13 = vpop.f32.mrf.mxu0 }
0x216f   :  { %2520 = vtanh.f32 %v1636_v28  ;;  %v2109_v31 = vmul.f32 -1.442695, %v1636_v28 }
0x2171   :  { %2522 = vpow2.f32 %v2109_v31 }
0x217c   :  { %v2521_v29 = vpop.eup %2520 }
0x217d   :  { %1649 = vrot.lane.b32.xlu1 %v2521_v29, %s2623_s2 }
0x217e   :  { %v2523_v32 = vpop.eup %2522 }
0x217f   :  { %v1640_v33 = vadd.f32 1.0, %v2523_v32 }
0x2181   :  { %2524 = vrcp.f32 %v1640_v33 }
0x218e   :  { %v2525_v34 = vpop.eup %2524 }
0x218f   :  { %v1647_v38 = vmul.f32 %v2525_v34, %v1645_v37 }
0x21ef   :  { %v1650_v35 = vpop.permute.xlu1 %1649 }
0x21f0   :  { %v1652_v36 = vmul.f32 %v2525_v34, %v1650_v35 }
0x21f2   :  { %1654 = vrot.lane.b32.xlu0 %v1652_v36, %s2624_s15 }
0x2264   :  { %v1655_v39 = vpop.permute.xlu0 %1654 }
0x2265   :  { %v1657_v40 = vadd.f32 %v1655_v39, %v1647_v38  ;;  %v1986_v38 = vld [vmem:[%s3060_s7 + $0x10] sm:$0xff]  ;;  %v1985_v39 = vld [vmem:[%s3060_s7 + $0x8] sm:$0xff] }
0x2267   :  { %2526 = vtanh.f32 %v1657_v40 }
0x2274   :  { %v2527_v41 = vpop.eup %2526 }
0x2275   :  { %1660 = vrot.lane.b32.xlu1 %v2527_v41, %s2623_s2 }
0x22e7   :  { %v1661_v42 = vpop.permute.xlu1 %1660 }
0x22e8   :  { %v1663_v11 = vmul.f32 %v2525_v34, %v1661_v42 }
0x22ea   :  { %1665 = vrot.lane.b32.xlu0 %v1663_v11, %s2624_s15 }
0x235c   :  { %v1666_v43 = vpop.permute.xlu0 %1665 }
0x235d   :  { %2380 = vmatmul.mubr.msk.f32.vlgmr.msra.gmra.mxu1 %vm171_vm4, %v1666_v43 }
0x235e   :  { %2394 = vmatpush3.msra.mxu1 %v2879_v51  ;;  %2401 = vmatprep.mubr.msk.f32.mxu1 %vm2622_vm0, %v2621_v1 }
0x235f   :  { %2395 = vmatprep.subr.mxu1 %v2621_v1 }
0x2360   :  { %2396 = vmatpush3.msra.mxu1 %v2885_v52 }
0x2361   :  { %2397 = vmatprep.subr.mxu1 %v2621_v1 }
0x2362   :  { %2398 = vmatpush3.msra.mxu1 %v2888_v53 }
0x2363   :  { %2399 = vmatprep.subr.mxu1 %v2621_v1 }
0x2364   :  { %2400 = vmatpush3.msra.mxu1 %v2897_v54  ;;  %v1751_v54 = vrot.slane %v1657_v40, 6  ;;  %v1984_v40 = vld [vmem:[%s3060_s7] sm:$0xff] }
0x241d   :  { %v1735_v44 = vpop.f32.mrf.mxu1 }
0x241e   :  { %v1740_v45 = vrot.slane %v1735_v44, 6 }
0x241f   :  { %v2381_v46 = vpop.f32.mrf.mxu1 }
0x2420   :  { %v1742_v51 = vadd.f32 %v1740_v45, %v2932_v63  ;;  %v2116_v45 = vld [vmem:[#allocation3] ss:$0 sm:$0xff] }
0x2422   :  { %2528 = vtanh.f32 %v1742_v51  ;;  %v2111_v48 = vmul.f32 -1.442695, %v1742_v51 }
0x2424   :  { %2530 = vpow2.f32 %v2111_v48 }
0x242f   :  { %v2529_v47 = vpop.eup %2528 }
0x2430   :  { %1755 = vrot.lane.b32.xlu1 %v2529_v47, %s2623_s2 }
0x2431   :  { %v2531_v52 = vpop.eup %2530 }
0x2432   :  { %v1746_v30 = vadd.f32 1.0, %v2531_v52 }
0x2434   :  { %2532 = vrcp.f32 %v1746_v30 }
0x2441   :  { %v2533_v49 = vpop.eup %2532 }
0x2442   :  { %v1753_v9 = vmul.f32 %v2533_v49, %v1751_v54 }
0x24a2   :  { %v1756_v53 = vpop.permute.xlu1 %1755 }
0x24a3   :  { %v1758_v50 = vmul.f32 %v2533_v49, %v1756_v53 }
0x24a5   :  { %1760 = vrot.lane.b32.xlu0 %v1758_v50, %s2624_s15 }
0x2517   :  { %v1761_v3 = vpop.permute.xlu0 %1760 }
0x2518   :  { %v1763_v55 = vadd.f32 %v1761_v3, %v1753_v9 }
0x251a   :  { %2534 = vtanh.f32 %v1763_v55  ;;  %v1858_v15 = vrot.slane %v1763_v55, 6 }
0x2527   :  { %v2535_v6 = vpop.eup %2534 }
0x2528   :  { %1766 = vrot.lane.b32.xlu1 %v2535_v6, %s2623_s2 }
0x259a   :  { %v1767_v56 = vpop.permute.xlu1 %1766 }
0x259b   :  { %v1769_v57 = vmul.f32 %v2533_v49, %v1767_v56 }
0x259d   :  { %v1771_v7 = vrot.slane %v1769_v57, 2 }
0x259f   :  { %1772 = vrot.lane.b32.xlu0 %v1771_v7, %s2624_s15 }
0x2611   :  { %v1773_v58 = vpop.permute.xlu0 %1772 }
0x2612   :  { %2391 = vmatmul.mubr.msk.f32.vlgmr.msra.gmra.mxu0 %vm171_vm4, %v1773_v58 }
0x2613   :  { %2412 = vmatprep.mubr.msk.f32.mxu0 %vm2622_vm0, %v2621_v1 }
0x26d2   :  { %v1842_v59 = vpop.f32.mrf.mxu0 }
0x26d3   :  { %v1847_v8 = vrot.slane %v1842_v59, 4 }
0x26d4   :  { %v2392_v60 = vpop.f32.mrf.mxu0 }
0x26d5   :  { %v1849_v61 = vadd.f32 %v1847_v8, %v2932_v63 }
0x26d7   :  { %2536 = vtanh.f32 %v1849_v61  ;;  %v2113_v0 = vmul.f32 -1.442695, %v1849_v61 }
0x26d9   :  { %2538 = vpow2.f32 %v2113_v0 }
0x26e4   :  { %v2537_v62 = vpop.eup %2536 }
0x26e5   :  { %1862 = vrot.lane.b32.xlu1 %v2537_v62, %s2623_s2 }
0x26e6   :  { %v2539_v4 = vpop.eup %2538 }
0x26e7   :  { %v1853_v5 = vadd.f32 1.0, %v2539_v4 }
0x26e9   :  { %2540 = vrcp.f32 %v1853_v5 }
0x26f6   :  { %v2541_v10 = vpop.eup %2540 }
0x26f7   :  { %v1860_v16 = vmul.f32 %v2541_v10, %v1858_v15 }
0x2757   :  { %v1863_v12 = vpop.permute.xlu1 %1862 }
0x2758   :  { %v1865_v14 = vmul.f32 %v2541_v10, %v1863_v12 }
0x275a   :  { %1867 = vrot.lane.b32.xlu0 %v1865_v14, %s2624_s15 }
0x27cc   :  { %v1868_v17 = vpop.permute.xlu0 %1867 }
0x27cd   :  { %v1870_v18 = vadd.f32 %v1868_v17, %v1860_v16 }
0x27cf   :  { %2542 = vtanh.f32 %v1870_v18  ;;  %v1965_v34 = vrot.slane %v1870_v18, 6 }
0x27dc   :  { %v2543_v19 = vpop.eup %2542 }
0x27dd   :  { %1873 = vrot.lane.b32.xlu1 %v2543_v19, %s2623_s2 }
0x284f   :  { %v1874_v20 = vpop.permute.xlu1 %1873 }
0x2850   :  { %v1876_v21 = vmul.f32 %v2541_v10, %v1874_v20 }
0x2852   :  { %v1878_v22 = vrot.slane %v1876_v21, 4 }
0x2854   :  { %1879 = vrot.lane.b32.xlu0 %v1878_v22, %s2624_s15 }
0x28c6   :  { %v1880_v2 = vpop.permute.xlu0 %1879 }
0x28c7   :  { %2402 = vmatmul.mubr.msk.f32.vlgmr.msra.gmra.mxu1 %vm171_vm4, %v1880_v2 }
0x2987   :  { %v1949_v23 = vpop.f32.mrf.mxu1 }
0x2988   :  { %v1954_v24 = vrot.slane %v1949_v23, 2 }
0x2989   :  { %v2403_v25 = vpop.f32.mrf.mxu1 }
0x298a   :  { %v1956_v26 = vadd.f32 %v1954_v24, %v2932_v63  ;;  %v1987_v63 = vld [vmem:[%s3060_s7 + $0x18] sm:$0xff] }
0x298b   :  { %2405 = vmatpush3.msra.mxu0 %v1987_v63 }
0x298c   :  { %2544 = vtanh.f32 %v1956_v26  ;;  %v2115_v28 = vmul.f32 -1.442695, %v1956_v26  ;;  %2406 = vmatprep.subr.mxu0 %v2621_v1 }
0x298d   :  { %2407 = vmatpush3.msra.mxu0 %v1986_v38 }
0x298e   :  { %2546 = vpow2.f32 %v2115_v28  ;;  %2408 = vmatprep.subr.mxu0 %v2621_v1 }
0x298f   :  { %2409 = vmatpush3.msra.mxu0 %v1985_v39 }
0x2990   :  { %2410 = vmatprep.subr.mxu0 %v2621_v1 }
0x2991   :  { %2411 = vmatpush3.msra.mxu0 %v1984_v40 }
0x2999   :  { %v2545_v27 = vpop.eup %2544 }
0x299a   :  { %1969 = vrot.lane.b32.xlu1 %v2545_v27, %s2623_s2 }
0x299b   :  { %v2547_v13 = vpop.eup %2546 }
0x299c   :  { %v1960_v29 = vadd.f32 1.0, %v2547_v13 }
0x299e   :  { %2548 = vrcp.f32 %v1960_v29 }
0x29ab   :  { %v2549_v31 = vpop.eup %2548 }
0x29ac   :  { %v1967_v35 = vmul.f32 %v2549_v31, %v1965_v34 }
0x2a0c   :  { %v1970_v32 = vpop.permute.xlu1 %1969 }
0x2a0d   :  { %v1972_v33 = vmul.f32 %v2549_v31, %v1970_v32 }
0x2a0f   :  { %1974 = vrot.lane.b32.xlu0 %v1972_v33, %s2624_s15 }
0x2a81   :  { %v1975_v36 = vpop.permute.xlu0 %1974 }
0x2a82   :  { %v1977_v37 = vadd.f32 %v1975_v36, %v1967_v35 }
0x2a84   :  { %2550 = vtanh.f32 %v1977_v37 }
0x2a91   :  { %v2551_v41 = vpop.eup %2550 }
0x2a92   :  { %1980 = vrot.lane.b32.xlu1 %v2551_v41, %s2623_s2 }
0x2b04   :  { %v1981_v42 = vpop.permute.xlu1 %1980 }
0x2b05   :  { %v1983_v11 = vmul.f32 %v2549_v31, %v1981_v42 }
0x2b07   :  { %v1996_v43 = vrot.slane %v1983_v11, 6 }
0x2b09   :  { %1997 = vrot.lane.b32.xlu0 %v1996_v43, %s2624_s15 }
0x2b7b   :  { %v1998_v44 = vpop.permute.xlu0 %1997 }
0x2b7c   :  { %2413 = vmatmul.mubr.msk.f32.vlgmr.msra.gmra.mxu0 %vm171_vm4, %v1998_v44 }
0x2c3c   :  { %v2067_v46 = vpop.f32.mrf.mxu0 }
0x2c3d   :  { %v2068_v51 = vadd.f32 %v2116_v45, %v2067_v46 }
0x2c3e   :  { %v2414_v47 = vpop.f32.mrf.mxu0 }
0x2c3f   :  { %2072 = vst.msk [vmem:[%s3062_s9] sm:$0x3] %vm2071_vm8, %v2068_v51 }
0x2c40   :  { %2077 = vsyncpa [#allocation5], 1 }
0x2c41   :  { %2078 = vsyncpa [#allocation7], 1 }

</bundles_post_ra>
